<compile_context>
chip_gen: v7x
topology: tpu7x:2x2x1
jax: 0.10.0
libtpu: 0.0.40
codegen_flags: <defaults>
</compile_context>

<pallas_src>
import functools

import jax
import jax.numpy as jnp
from jax.experimental import pallas as pl
from jax.experimental.pallas import tpu as pltpu


# ----------------------------------------------------------------------------
# Fused matmul + bias + activation Pallas kernel (the compute hot path).
# ----------------------------------------------------------------------------
def _softplus(x):
    # numerically stable softplus: max(x,0) + log1p(exp(-|x|))
    return jnp.maximum(x, 0.0) + jnp.log1p(jnp.exp(-jnp.abs(x)))


def _mm_bias_act_kernel(x_ref, w_ref, b_ref, o_ref, *, activation, split):
    acc = jnp.dot(x_ref[...], w_ref[...], preferred_element_type=jnp.float32)
    acc = acc + b_ref[...]  # bias broadcast over rows, shape (1, N)
    if activation == "relu":
        acc = jnp.maximum(acc, 0.0)
    elif activation == "softplus_plus1":
        acc = _softplus(acc) + 1.0
    elif activation == "head_mixed":
        # columns [0, split): softplus(.) + 1  (alpha/beta heads)
        # columns [split, N): identity          (critic value)
        sp = _softplus(acc) + 1.0
        col = jax.lax.broadcasted_iota(jnp.int32, acc.shape, 1)
        acc = jnp.where(col < split, sp, acc)
    # activation == "none": identity
    o_ref[...] = acc.astype(o_ref.dtype)


def _round_up(x, m):
    return ((x + m - 1) // m) * m


def _pick_tm(K, N, out_bytes):
    """Largest 8-aligned M-tile (capped at 512) that keeps the double-buffered
    working set well under the default scoped-VMEM limit on all generations."""
    budget = 12 * 1024 * 1024
    per_row = 2 * (K * 2 + N * out_bytes)      # 2x-buffered x block (bf16) + out block
    fixed = 2 * (K * N * 2 + N * 4)            # weight (bf16) + bias (f32) buffers
    tm = (budget - fixed) // max(per_row, 1)
    return max(8, min(512, (tm // 8) * 8))


def matmul_bias_act(x, w, b, activation="none", *, split=0, out_dtype=jnp.float32):
    """y = act(x @ w + b).  x:(M,K)  w:(K,N) bf16  b:(N,) -> (M,N) out_dtype.

    bf16 MXU operands, f32 accumulation, M tiled on a 'parallel' grid axis.
    """
    M, K = x.shape
    K2, N = w.shape
    assert K == K2
    x = x.astype(jnp.bfloat16)
    w = w.astype(jnp.bfloat16)
    b2 = b.reshape(1, N).astype(jnp.float32)
    out_bytes = jnp.dtype(out_dtype).itemsize

    tm = _pick_tm(K, N, out_bytes)
    if M <= tm:
        tm = _round_up(M, 8)           # single 8-aligned block
    m_pad = _round_up(M, tm)
    if m_pad != M:
        x = jnp.pad(x, ((0, m_pad - M), (0, 0)))
    grid = (m_pad // tm,)

    transcendentals = (
        m_pad * N * 2 if activation in ("softplus_plus1", "head_mixed") else 0
    )
    cost = pl.CostEstimate(
        flops=2 * m_pad * K * N,
        transcendentals=transcendentals,
        bytes_accessed=m_pad * K * 2 + K * N * 2 + N * 4 + m_pad * N * out_bytes,
    )

    kernel = functools.partial(_mm_bias_act_kernel, activation=activation, split=split)
    y = pl.pallas_call(
        kernel,
        out_shape=jax.ShapeDtypeStruct((m_pad, N), out_dtype),
        grid=grid,
        in_specs=[
            pl.BlockSpec((tm, K), lambda i: (i, 0)),
            pl.BlockSpec((K, N), lambda i: (0, 0)),
            pl.BlockSpec((1, N), lambda i: (0, 0)),
        ],
        out_specs=pl.BlockSpec((tm, N), lambda i: (i, 0)),
        compiler_params=pltpu.CompilerParams(
            dimension_semantics=("parallel",),
            vmem_limit_bytes=32 * 1024 * 1024,
        ),
        cost_estimate=cost,
    )(x, w, b2)
    return y[:M] if m_pad != M else y


# ----------------------------------------------------------------------------
# im2col glue (plain JAX, NHWC): slices + stack only, no big transposes.
# ----------------------------------------------------------------------------
def im2col_nhwc(x, kh, kw, stride):
    """x:(B,H,W,C) -> patches:(B*OH*OW, KH*KW*C) with feature order (KH,KW,C)."""
    B, H, W, C = x.shape
    oh = (H - kh) // stride + 1
    ow = (W - kw) // stride + 1
    slabs = []
    for i in range(kh):
        for j in range(kw):
            slabs.append(
                x[:, i : i + (oh - 1) * stride + 1 : stride,
                     j : j + (ow - 1) * stride + 1 : stride, :]
            )
    p = jnp.stack(slabs, axis=3)  # (B, OH, OW, KH*KW, C)
    return p.reshape(B * oh * ow, kh * kw * C), oh, ow


def conv2d_relu_nhwc(x, w_mat, b, kh, kw, stride):
    """Valid cross-correlation conv + bias + ReLU; NHWC in, NHWC (bf16) out.

    w_mat is the pre-reshaped (KH*KW*C_in, C_out) weight matrix.
    """
    B = x.shape[0]
    patches, oh, ow = im2col_nhwc(x, kh, kw, stride)
    y = matmul_bias_act(patches, w_mat, b, "relu", out_dtype=jnp.bfloat16)
    return y.reshape(B, oh, ow, -1)


# ----------------------------------------------------------------------------
# Shapes helpers
# ----------------------------------------------------------------------------
def conv_out_hw(state_dim):
    _, h, w = state_dim
    oh1, ow1 = (h - 8) // 4 + 1, (w - 8) // 4 + 1
    oh2, ow2 = (oh1 - 4) // 2 + 1, (ow1 - 4) // 2 + 1
    return oh2 - 2, ow2 - 2


def conv_out_size_for(state_dim):
    oh3, ow3 = conv_out_hw(state_dim)
    return 64 * oh3 * ow3


# ----------------------------------------------------------------------------
# Parameter init (PyTorch-layout, fan-in uniform) + one-time preparation
# into the TPU-friendly layouts used by the forward pass.
# ----------------------------------------------------------------------------
def _uniform(key, shape, fan_in):
    bound = 1.0 / (fan_in ** 0.5)
    return jax.random.uniform(key, shape, jnp.float32, -bound, bound)


def init_raw_params(key, state_dim, n_actions, conv_out_size):
    c_in = state_dim[0]
    ks = jax.random.split(key, 16)
    p = {}
    p["conv1_w"] = _uniform(ks[0], (32, c_in, 8, 8), c_in * 8 * 8)
    p["conv1_b"] = _uniform(ks[1], (32,), c_in * 8 * 8)
    p["conv2_w"] = _uniform(ks[2], (64, 32, 4, 4), 32 * 4 * 4)
    p["conv2_b"] = _uniform(ks[3], (64,), 32 * 4 * 4)
    p["conv3_w"] = _uniform(ks[4], (64, 64, 3, 3), 64 * 3 * 3)
    p["conv3_b"] = _uniform(ks[5], (64,), 64 * 3 * 3)
    p["actor_fc_w"] = _uniform(ks[6], (256, conv_out_size), conv_out_size)
    p["actor_fc_b"] = _uniform(ks[7], (256,), conv_out_size)
    p["alpha_w"] = _uniform(ks[8], (n_actions, 256), 256)
    p["alpha_b"] = _uniform(ks[9], (n_actions,), 256)
    p["beta_w"] = _uniform(ks[10], (n_actions, 256), 256)
    p["beta_b"] = _uniform(ks[11], (n_actions,), 256)
    p["critic1_w"] = _uniform(ks[12], (256, conv_out_size), conv_out_size)
    p["critic1_b"] = _uniform(ks[13], (256,), conv_out_size)
    p["critic2_w"] = _uniform(ks[14], (1, 256), 256)
    p["critic2_b"] = _uniform(ks[15], (1,), 256)
    return p


def prepare_params(raw, state_dim, n_actions):
    """One-time host-side re-layout: conv weights -> (KH*KW*C_in, C_out) bf16,
    FC column order (C,H,W)->(H,W,C), trunk/head weight fusion."""
    h3, w3 = conv_out_hw(state_dim)
    A = n_actions

    def conv_w(w):  # (C_out, C_in, KH, KW) -> (KH*KW*C_in, C_out)
        c_out, ci, kh, kw = w.shape
        return jnp.transpose(w, (2, 3, 1, 0)).reshape(kh * kw * ci, c_out).astype(jnp.bfloat16)

    def fc_cols_hwc(w):  # permute columns from PyTorch (C,H,W) flatten to (H,W,C)
        out_dim = w.shape[0]
        return w.reshape(out_dim, 64, h3, w3).transpose(0, 2, 3, 1).reshape(out_dim, -1)

    p = {
        "conv1_w": conv_w(raw["conv1_w"]), "conv1_b": raw["conv1_b"].astype(jnp.float32),
        "conv2_w": conv_w(raw["conv2_w"]), "conv2_b": raw["conv2_b"].astype(jnp.float32),
        "conv3_w": conv_w(raw["conv3_w"]), "conv3_b": raw["conv3_b"].astype(jnp.float32),
    }

    # Fused trunk: [actor_fc | critic1]  -> (conv_out, 512)
    trunk_w = jnp.concatenate(
        [fc_cols_hwc(raw["actor_fc_w"]).T, fc_cols_hwc(raw["critic1_w"]).T], axis=1
    )
    p["trunk_w"] = trunk_w.astype(jnp.bfloat16)
    p["trunk_b"] = jnp.concatenate(
        [raw["actor_fc_b"], raw["critic1_b"]]
    ).astype(jnp.float32)

    # Fused heads: [alpha | beta | value] -> (512, 2A+1), block-structured.
    head_w = jnp.zeros((512, 2 * A + 1), jnp.float32)
    head_w = head_w.at[:256, :A].set(raw["alpha_w"].T)
    head_w = head_w.at[:256, A:2 * A].set(raw["beta_w"].T)
    head_w = head_w.at[256:, 2 * A:].set(raw["critic2_w"].T)
    p["head_w"] = head_w.astype(jnp.bfloat16)
    p["head_b"] = jnp.concatenate(
        [raw["alpha_b"], raw["beta_b"], raw["critic2_b"]]
    ).astype(jnp.float32)
    return p


# ----------------------------------------------------------------------------
# RacingNet forward
# ----------------------------------------------------------------------------
def racing_net_forward(params, x, *, n_actions):
    """x: (B, C, H, W) float32 -> (value:(B,1), alpha:(B,A), beta:(B,A))."""
    B = x.shape[0]
    x = jnp.transpose(x, (0, 2, 3, 1))  # single NCHW -> NHWC conversion

    # conv stack: Conv(8,s4)+ReLU -> Conv(4,s2)+ReLU -> Conv(3,s1)+ReLU
    h = conv2d_relu_nhwc(x, params["conv1_w"], params["conv1_b"], 8, 8, 4)
    h = conv2d_relu_nhwc(h, params["conv2_w"], params["conv2_b"], 4, 4, 2)
    h = conv2d_relu_nhwc(h, params["conv3_w"], params["conv3_b"], 3, 3, 1)
    flat = h.reshape(B, -1)  # (H, W, C) order; FC weight columns pre-permuted

    # fused actor_fc + critic1:  trunk = relu(flat @ [Wa | Wc1] + [ba | bc1])
    trunk = matmul_bias_act(flat, params["trunk_w"], params["trunk_b"], "relu",
                            out_dtype=jnp.bfloat16)

    # fused alpha/beta/value heads with per-column activation
    A = n_actions
    heads = matmul_bias_act(trunk, params["head_w"], params["head_b"], "head_mixed",
                            split=2 * A, out_dtype=jnp.float32)
    alpha = heads[:, :A]
    beta = heads[:, A:2 * A]
    value = heads[:, 2 * A:2 * A + 1]
    return value, alpha, beta


if __name__ == "__main__":
    # Small-but-valid shapes: batch=2, state_dim=(4, 48, 48), action_dim=(3,)
    state_dim = (4, 48, 48)
    action_dim = (3,)
    batch = 2

    key = jax.random.PRNGKey(0)
    k_x, k_p = jax.random.split(key)
    x = jax.random.normal(k_x, (batch,) + state_dim, dtype=jnp.float32)

    conv_out = conv_out_size_for(state_dim)  # = 64 * 2 * 2 = 256
    raw = init_raw_params(k_p, state_dim, action_dim[0], conv_out)
    params = prepare_params(raw, state_dim, action_dim[0])

    fwd = jax.jit(functools.partial(racing_net_forward, n_actions=action_dim[0]))
    value, alpha, beta = fwd(params, x)
    jax.block_until_ready((value, alpha, beta))

    assert value.shape == (batch, 1)
    assert alpha.shape == (batch, action_dim[0])
    assert beta.shape == (batch, action_dim[0])
    assert bool(jnp.all(jnp.isfinite(value)))
    # alpha/beta come from softplus(.) + 1 > 1
    assert bool(jnp.all(alpha > 1.0)) and bool(jnp.all(beta > 1.0))

    print("KERNEL_OK")
</pallas_src>

<mosaic_0001>
module attributes {stable_mosaic.version = 11 : i64} {
  func.func @_mm_bias_act_kernel(%arg0: i32, %arg1: memref<248x256xbf16, #tpu.memory_space<vmem>>, %arg2: memref<256x32xbf16, #tpu.memory_space<vmem>>, %arg3: memref<1x32xf32, #tpu.memory_space<vmem>>, %arg4: memref<248x32xbf16, #tpu.memory_space<vmem>>) attributes {dimension_semantics = [#tpu.dimension_semantics<parallel>], iteration_bounds = array<i64: 1>, scalar_prefetch = 0 : i64, scratch_operands = 0 : i64, tpu.core_type = #tpu.core_type<tc>, window_params = [{transform_indices = @transform_0, window_bounds = array<i64: 248, 256>}, {pipeline_mode = #tpu.pipeline_mode<synchronous>, transform_indices = @transform_1, window_bounds = array<i64: 256, 32>}, {pipeline_mode = #tpu.pipeline_mode<synchronous>, transform_indices = @transform_2, window_bounds = array<i64: 1, 32>}, {transform_indices = @transform_3, window_bounds = array<i64: 248, 32>}]} {
    %c0 = arith.constant 0 : index
    %c0_0 = arith.constant 0 : index
    %0 = vector.load %arg1[%c0, %c0_0] : memref<248x256xbf16, #tpu.memory_space<vmem>>, vector<248x256xbf16>
    %c0_1 = arith.constant 0 : index
    %c0_2 = arith.constant 0 : index
    %1 = vector.load %arg2[%c0_1, %c0_2] : memref<256x32xbf16, #tpu.memory_space<vmem>>, vector<256x32xbf16>
    %cst = arith.constant dense<0.000000e+00> : vector<248x32xf32>
    %2 = tpu.matmul %0, %1, %cst {dimension_numbers = #tpu.dot_dimension_numbers<[1], [0], [0], [1], [0, 0, 1, 1], [], []>} : vector<248x256xbf16>, vector<256x32xbf16>, vector<248x32xf32> -> vector<248x32xf32>
    %c0_3 = arith.constant 0 : index
    %c0_4 = arith.constant 0 : index
    %3 = vector.load %arg3[%c0_3, %c0_4] : memref<1x32xf32, #tpu.memory_space<vmem>>, vector<1x32xf32>
    %4 = vector.broadcast %3 : vector<1x32xf32> to vector<248x32xf32>
    %5 = arith.addf %2, %4 : vector<248x32xf32>
    %cst_5 = arith.constant 0.000000e+00 : f32
    %6 = vector.broadcast %cst_5 : f32 to vector<248x32xf32>
    %7 = arith.maximumf %5, %6 : vector<248x32xf32>
    %8 = arith.truncf %7 : vector<248x32xf32> to vector<248x32xbf16>
    %c0_6 = arith.constant 0 : index
    %c0_7 = arith.constant 0 : index
    %9 = vector.load %arg4[%c0_6, %c0_7] : memref<248x32xbf16, #tpu.memory_space<vmem>>, vector<248x32xbf16>
    tpu.vector_store %arg4[%c0_6, %c0_7], %8 {strides = array<i32>} : memref<248x32xbf16, #tpu.memory_space<vmem>>, vector<248x32xbf16>,
    return
  }
  func.func @transform_0(%arg0: i32) -> (i32, i32) {
    %c0_i32 = arith.constant 0 : i32
    %c0_i32_0 = arith.constant 0 : i32
    return %arg0, %c0_i32 : i32, i32
  }
  func.func @transform_1(%arg0: i32) -> (i32, i32) {
    %c0_i32 = arith.constant 0 : i32
    %c0_i32_0 = arith.constant 0 : i32
    %c0_i32_1 = arith.constant 0 : i32
    return %c0_i32, %c0_i32_0 : i32, i32
  }
  func.func @transform_2(%arg0: i32) -> (i32, i32) {
    %c0_i32 = arith.constant 0 : i32
    %c0_i32_0 = arith.constant 0 : i32
    %c0_i32_1 = arith.constant 0 : i32
    return %c0_i32, %c0_i32_0 : i32, i32
  }
  func.func @transform_3(%arg0: i32) -> (i32, i32) {
    %c0_i32 = arith.constant 0 : i32
    %c0_i32_0 = arith.constant 0 : i32
    return %arg0, %c0_i32 : i32, i32
  }
}

module attributes {stable_mosaic.version = 11 : i64} {
  func.func @_mm_bias_act_kernel(%arg0: i32, %arg1: memref<32x512xbf16, #tpu.memory_space<vmem>>, %arg2: memref<512x64xbf16, #tpu.memory_space<vmem>>, %arg3: memref<1x64xf32, #tpu.memory_space<vmem>>, %arg4: memref<32x64xbf16, #tpu.memory_space<vmem>>) attributes {dimension_semantics = [#tpu.dimension_semantics<parallel>], iteration_bounds = array<i64: 1>, scalar_prefetch = 0 : i64, scratch_operands = 0 : i64, tpu.core_type = #tpu.core_type<tc>, window_params = [{transform_indices = @transform_0, window_bounds = array<i64: 32, 512>}, {pipeline_mode = #tpu.pipeline_mode<synchronous>, transform_indices = @transform_1, window_bounds = array<i64: 512, 64>}, {pipeline_mode = #tpu.pipeline_mode<synchronous>, transform_indices = @transform_2, window_bounds = array<i64: 1, 64>}, {transform_indices = @transform_3, window_bounds = array<i64: 32, 64>}]} {
    %c0 = arith.constant 0 : index
    %c0_0 = arith.constant 0 : index
    %0 = vector.load %arg1[%c0, %c0_0] : memref<32x512xbf16, #tpu.memory_space<vmem>>, vector<32x512xbf16>
    %c0_1 = arith.constant 0 : index
    %c0_2 = arith.constant 0 : index
    %1 = vector.load %arg2[%c0_1, %c0_2] : memref<512x64xbf16, #tpu.memory_space<vmem>>, vector<512x64xbf16>
    %cst = arith.constant dense<0.000000e+00> : vector<32x64xf32>
    %2 = tpu.matmul %0, %1, %cst {dimension_numbers = #tpu.dot_dimension_numbers<[1], [0], [0], [1], [0, 0, 1, 1], [], []>} : vector<32x512xbf16>, vector<512x64xbf16>, vector<32x64xf32> -> vector<32x64xf32>
    %c0_3 = arith.constant 0 : index
    %c0_4 = arith.constant 0 : index
    %3 = vector.load %arg3[%c0_3, %c0_4] : memref<1x64xf32, #tpu.memory_space<vmem>>, vector<1x64xf32>
    %4 = vector.broadcast %3 : vector<1x64xf32> to vector<32x64xf32>
    %5 = arith.addf %2, %4 : vector<32x64xf32>
    %cst_5 = arith.constant 0.000000e+00 : f32
    %6 = vector.broadcast %cst_5 : f32 to vector<32x64xf32>
    %7 = arith.maximumf %5, %6 : vector<32x64xf32>
    %8 = arith.truncf %7 : vector<32x64xf32> to vector<32x64xbf16>
    %c0_6 = arith.constant 0 : index
    %c0_7 = arith.constant 0 : index
    %9 = vector.load %arg4[%c0_6, %c0_7] : memref<32x64xbf16, #tpu.memory_space<vmem>>, vector<32x64xbf16>
    tpu.vector_store %arg4[%c0_6, %c0_7], %8 {strides = array<i32>} : memref<32x64xbf16, #tpu.memory_space<vmem>>, vector<32x64xbf16>,
    return
  }
  func.func @transform_0(%arg0: i32) -> (i32, i32) {
    %c0_i32 = arith.constant 0 : i32
    %c0_i32_0 = arith.constant 0 : i32
    return %arg0, %c0_i32 : i32, i32
  }
  func.func @transform_1(%arg0: i32) -> (i32, i32) {
    %c0_i32 = arith.constant 0 : i32
    %c0_i32_0 = arith.constant 0 : i32
    %c0_i32_1 = arith.constant 0 : i32
    return %c0_i32, %c0_i32_0 : i32, i32
  }
  func.func @transform_2(%arg0: i32) -> (i32, i32) {
    %c0_i32 = arith.constant 0 : i32
    %c0_i32_0 = arith.constant 0 : i32
    %c0_i32_1 = arith.constant 0 : i32
    return %c0_i32, %c0_i32_0 : i32, i32
  }
  func.func @transform_3(%arg0: i32) -> (i32, i32) {
    %c0_i32 = arith.constant 0 : i32
    %c0_i32_0 = arith.constant 0 : i32
    return %arg0, %c0_i32 : i32, i32
  }
}

module attributes {stable_mosaic.version = 11 : i64} {
  func.func @_mm_bias_act_kernel(%arg0: i32, %arg1: memref<8x256xbf16, #tpu.memory_space<vmem>>, %arg2: memref<256x512xbf16, #tpu.memory_space<vmem>>, %arg3: memref<1x512xf32, #tpu.memory_space<vmem>>, %arg4: memref<8x512xbf16, #tpu.memory_space<vmem>>) attributes {dimension_semantics = [#tpu.dimension_semantics<parallel>], iteration_bounds = array<i64: 1>, scalar_prefetch = 0 : i64, scratch_operands = 0 : i64, tpu.core_type = #tpu.core_type<tc>, window_params = [{transform_indices = @transform_0, window_bounds = array<i64: 8, 256>}, {pipeline_mode = #tpu.pipeline_mode<synchronous>, transform_indices = @transform_1, window_bounds = array<i64: 256, 512>}, {pipeline_mode = #tpu.pipeline_mode<synchronous>, transform_indices = @transform_2, window_bounds = array<i64: 1, 512>}, {transform_indices = @transform_3, window_bounds = array<i64: 8, 512>}]} {
    %c0 = arith.constant 0 : index
    %c0_0 = arith.constant 0 : index
    %0 = vector.load %arg1[%c0, %c0_0] : memref<8x256xbf16, #tpu.memory_space<vmem>>, vector<8x256xbf16>
    %c0_1 = arith.constant 0 : index
    %c0_2 = arith.constant 0 : index
    %1 = vector.load %arg2[%c0_1, %c0_2] : memref<256x512xbf16, #tpu.memory_space<vmem>>, vector<256x512xbf16>
    %cst = arith.constant dense<0.000000e+00> : vector<8x512xf32>
    %2 = tpu.matmul %0, %1, %cst {dimension_numbers = #tpu.dot_dimension_numbers<[1], [0], [0], [1], [0, 0, 1, 1], [], []>} : vector<8x256xbf16>, vector<256x512xbf16>, vector<8x512xf32> -> vector<8x512xf32>
    %c0_3 = arith.constant 0 : index
    %c0_4 = arith.constant 0 : index
    %3 = vector.load %arg3[%c0_3, %c0_4] : memref<1x512xf32, #tpu.memory_space<vmem>>, vector<1x512xf32>
    %4 = vector.broadcast %3 : vector<1x512xf32> to vector<8x512xf32>
    %5 = arith.addf %2, %4 : vector<8x512xf32>
    %cst_5 = arith.constant 0.000000e+00 : f32
    %6 = vector.broadcast %cst_5 : f32 to vector<8x512xf32>
    %7 = arith.maximumf %5, %6 : vector<8x512xf32>
    %8 = arith.truncf %7 : vector<8x512xf32> to vector<8x512xbf16>
    %c0_6 = arith.constant 0 : index
    %c0_7 = arith.constant 0 : index
    %9 = vector.load %arg4[%c0_6, %c0_7] : memref<8x512xbf16, #tpu.memory_space<vmem>>, vector<8x512xbf16>
    tpu.vector_store %arg4[%c0_6, %c0_7], %8 {strides = array<i32>} : memref<8x512xbf16, #tpu.memory_space<vmem>>, vector<8x512xbf16>,
    return
  }
  func.func @transform_0(%arg0: i32) -> (i32, i32) {
    %c0_i32 = arith.constant 0 : i32
    %c0_i32_0 = arith.constant 0 : i32
    return %arg0, %c0_i32 : i32, i32
  }
  func.func @transform_1(%arg0: i32) -> (i32, i32) {
    %c0_i32 = arith.constant 0 : i32
    %c0_i32_0 = arith.constant 0 : i32
    %c0_i32_1 = arith.constant 0 : i32
    return %c0_i32, %c0_i32_0 : i32, i32
  }
  func.func @transform_2(%arg0: i32) -> (i32, i32) {
    %c0_i32 = arith.constant 0 : i32
    %c0_i32_0 = arith.constant 0 : i32
    %c0_i32_1 = arith.constant 0 : i32
    return %c0_i32, %c0_i32_0 : i32, i32
  }
  func.func @transform_3(%arg0: i32) -> (i32, i32) {
    %c0_i32 = arith.constant 0 : i32
    %c0_i32_0 = arith.constant 0 : i32
    return %arg0, %c0_i32 : i32, i32
  }
}

module attributes {stable_mosaic.version = 11 : i64} {
  func.func @_mm_bias_act_kernel(%arg0: i32, %arg1: memref<8x576xbf16, #tpu.memory_space<vmem>>, %arg2: memref<576x64xbf16, #tpu.memory_space<vmem>>, %arg3: memref<1x64xf32, #tpu.memory_space<vmem>>, %arg4: memref<8x64xbf16, #tpu.memory_space<vmem>>) attributes {dimension_semantics = [#tpu.dimension_semantics<parallel>], iteration_bounds = array<i64: 1>, scalar_prefetch = 0 : i64, scratch_operands = 0 : i64, tpu.core_type = #tpu.core_type<tc>, window_params = [{transform_indices = @transform_0, window_bounds = array<i64: 8, 576>}, {pipeline_mode = #tpu.pipeline_mode<synchronous>, transform_indices = @transform_1, window_bounds = array<i64: 576, 64>}, {pipeline_mode = #tpu.pipeline_mode<synchronous>, transform_indices = @transform_2, window_bounds = array<i64: 1, 64>}, {transform_indices = @transform_3, window_bounds = array<i64: 8, 64>}]} {
    %c0 = arith.constant 0 : index
    %c0_0 = arith.constant 0 : index
    %0 = vector.load %arg1[%c0, %c0_0] : memref<8x576xbf16, #tpu.memory_space<vmem>>, vector<8x576xbf16>
    %c0_1 = arith.constant 0 : index
    %c0_2 = arith.constant 0 : index
    %1 = vector.load %arg2[%c0_1, %c0_2] : memref<576x64xbf16, #tpu.memory_space<vmem>>, vector<576x64xbf16>
    %cst = arith.constant dense<0.000000e+00> : vector<8x64xf32>
    %2 = tpu.matmul %0, %1, %cst {dimension_numbers = #tpu.dot_dimension_numbers<[1], [0], [0], [1], [0, 0, 1, 1], [], []>} : vector<8x576xbf16>, vector<576x64xbf16>, vector<8x64xf32> -> vector<8x64xf32>
    %c0_3 = arith.constant 0 : index
    %c0_4 = arith.constant 0 : index
    %3 = vector.load %arg3[%c0_3, %c0_4] : memref<1x64xf32, #tpu.memory_space<vmem>>, vector<1x64xf32>
    %4 = vector.broadcast %3 : vector<1x64xf32> to vector<8x64xf32>
    %5 = arith.addf %2, %4 : vector<8x64xf32>
    %cst_5 = arith.constant 0.000000e+00 : f32
    %6 = vector.broadcast %cst_5 : f32 to vector<8x64xf32>
    %7 = arith.maximumf %5, %6 : vector<8x64xf32>
    %8 = arith.truncf %7 : vector<8x64xf32> to vector<8x64xbf16>
    %c0_6 = arith.constant 0 : index
    %c0_7 = arith.constant 0 : index
    %9 = vector.load %arg4[%c0_6, %c0_7] : memref<8x64xbf16, #tpu.memory_space<vmem>>, vector<8x64xbf16>
    tpu.vector_store %arg4[%c0_6, %c0_7], %8 {strides = array<i32>} : memref<8x64xbf16, #tpu.memory_space<vmem>>, vector<8x64xbf16>,
    return
  }
  func.func @transform_0(%arg0: i32) -> (i32, i32) {
    %c0_i32 = arith.constant 0 : i32
    %c0_i32_0 = arith.constant 0 : i32
    return %arg0, %c0_i32 : i32, i32
  }
  func.func @transform_1(%arg0: i32) -> (i32, i32) {
    %c0_i32 = arith.constant 0 : i32
    %c0_i32_0 = arith.constant 0 : i32
    %c0_i32_1 = arith.constant 0 : i32
    return %c0_i32, %c0_i32_0 : i32, i32
  }
  func.func @transform_2(%arg0: i32) -> (i32, i32) {
    %c0_i32 = arith.constant 0 : i32
    %c0_i32_0 = arith.constant 0 : i32
    %c0_i32_1 = arith.constant 0 : i32
    return %c0_i32, %c0_i32_0 : i32, i32
  }
  func.func @transform_3(%arg0: i32) -> (i32, i32) {
    %c0_i32 = arith.constant 0 : i32
    %c0_i32_0 = arith.constant 0 : i32
    return %arg0, %c0_i32 : i32, i32
  }
}

module attributes {stable_mosaic.version = 11 : i64} {
  func.func @_mm_bias_act_kernel(%arg0: i32, %arg1: memref<8x512xbf16, #tpu.memory_space<vmem>>, %arg2: memref<512x7xbf16, #tpu.memory_space<vmem>>, %arg3: memref<1x7xf32, #tpu.memory_space<vmem>>, %arg4: memref<8x7xf32, #tpu.memory_space<vmem>>) attributes {dimension_semantics = [#tpu.dimension_semantics<parallel>], iteration_bounds = array<i64: 1>, scalar_prefetch = 0 : i64, scratch_operands = 0 : i64, tpu.core_type = #tpu.core_type<tc>, window_params = [{transform_indices = @transform_0, window_bounds = array<i64: 8, 512>}, {pipeline_mode = #tpu.pipeline_mode<synchronous>, transform_indices = @transform_1, window_bounds = array<i64: 512, 7>}, {pipeline_mode = #tpu.pipeline_mode<synchronous>, transform_indices = @transform_2, window_bounds = array<i64: 1, 7>}, {transform_indices = @transform_3, window_bounds = array<i64: 8, 7>}]} {
    %c0 = arith.constant 0 : index
    %c0_0 = arith.constant 0 : index
    %0 = vector.load %arg1[%c0, %c0_0] : memref<8x512xbf16, #tpu.memory_space<vmem>>, vector<8x512xbf16>
    %c0_1 = arith.constant 0 : index
    %c0_2 = arith.constant 0 : index
    %1 = vector.load %arg2[%c0_1, %c0_2] : memref<512x7xbf16, #tpu.memory_space<vmem>>, vector<512x7xbf16>
    %cst = arith.constant dense<0.000000e+00> : vector<8x7xf32>
    %2 = tpu.matmul %0, %1, %cst {dimension_numbers = #tpu.dot_dimension_numbers<[1], [0], [0], [1], [0, 0, 1, 1], [], []>} : vector<8x512xbf16>, vector<512x7xbf16>, vector<8x7xf32> -> vector<8x7xf32>
    %c0_3 = arith.constant 0 : index
    %c0_4 = arith.constant 0 : index
    %3 = vector.load %arg3[%c0_3, %c0_4] : memref<1x7xf32, #tpu.memory_space<vmem>>, vector<1x7xf32>
    %4 = vector.broadcast %3 : vector<1x7xf32> to vector<8x7xf32>
    %5 = arith.addf %2, %4 : vector<8x7xf32>
    %cst_5 = arith.constant 0.000000e+00 : f32
    %6 = vector.broadcast %cst_5 : f32 to vector<8x7xf32>
    %7 = arith.maximumf %5, %6 : vector<8x7xf32>
    %8 = math.absf %5 : vector<8x7xf32>
    %cst_6 = arith.constant 0.000000e+00 : f32
    %9 = vector.broadcast %cst_6 : f32 to vector<8x7xf32>
    %10 = arith.subf %9, %8 : vector<8x7xf32>
    %11 = math.exp %10 : vector<8x7xf32>
    %12 = math.log1p %11 : vector<8x7xf32>
    %13 = arith.addf %7, %12 : vector<8x7xf32>
    %cst_7 = arith.constant 1.000000e+00 : f32
    %14 = vector.broadcast %cst_7 : f32 to vector<8x7xf32>
    %15 = arith.addf %13, %14 : vector<8x7xf32>
    %16 = tpu.iota {dimensions = array<i32: 1>} : vector<8x7xi32>
    %c6_i32 = arith.constant 6 : i32
    %17 = vector.broadcast %c6_i32 : i32 to vector<8x7xi32>
    %18 = arith.cmpi slt, %16, %17 : vector<8x7xi32>
    %19 = arith.select %18, %15, %5 : vector<8x7xi1>, vector<8x7xf32>
    %c0_8 = arith.constant 0 : index
    %c0_9 = arith.constant 0 : index
    %20 = vector.load %arg4[%c0_8, %c0_9] : memref<8x7xf32, #tpu.memory_space<vmem>>, vector<8x7xf32>
    tpu.vector_store %arg4[%c0_8, %c0_9], %19 {strides = array<i32>} : memref<8x7xf32, #tpu.memory_space<vmem>>, vector<8x7xf32>,
    return
  }
  func.func @transform_0(%arg0: i32) -> (i32, i32) {
    %c0_i32 = arith.constant 0 : i32
    %c0_i32_0 = arith.constant 0 : i32
    return %arg0, %c0_i32 : i32, i32
  }
  func.func @transform_1(%arg0: i32) -> (i32, i32) {
    %c0_i32 = arith.constant 0 : i32
    %c0_i32_0 = arith.constant 0 : i32
    %c0_i32_1 = arith.constant 0 : i32
    return %c0_i32, %c0_i32_0 : i32, i32
  }
  func.func @transform_2(%arg0: i32) -> (i32, i32) {
    %c0_i32 = arith.constant 0 : i32
    %c0_i32_0 = arith.constant 0 : i32
    %c0_i32_1 = arith.constant 0 : i32
    return %c0_i32, %c0_i32_0 : i32, i32
  }
  func.func @transform_3(%arg0: i32) -> (i32, i32) {
    %c0_i32 = arith.constant 0 : i32
    %c0_i32_0 = arith.constant 0 : i32
    return %arg0, %c0_i32 : i32, i32
  }
}

</mosaic_0001>

<bundles_post_ra>
// kernel: racing_net_forward.5
= control target key start
LH: loop header
LB: loop body
LE: loop exit
PB: predicated region body
PF: predicated region fallthrough
CT: control target
= control target key end

     0   :  { %vm654_vm0 = vcmask 257024   ;;  %s1313_s1 = inlined_call_operand.vmem [shape: bf16[256,32], index: 1, kind: input, shape index: {}]   ;;  %s1314_s0 = inlined_call_operand.vmem [shape: bf16[248,256], index: 0, kind: input, shape index: {}]   ;;  %s1315_s2 = inlined_call_operand.vmem [shape: f32[1,32], index: 2, kind: input, shape index: {}]   ;;  %s1316_s3 = inlined_call_operand.vmem [shape: bf16[248,32], index: 3, kind: output, shape index: {}]  }
   0x1   :  { %v929_v0 = vld [vmem:[%s1313_s1 + $0x40] sm:$0xff]   ;;  %v931_v2 = vld [vmem:[%s1313_s1 + $0x48] sm:$0xff]   ;;  %v933_v4 = vld [vmem:[%s1313_s1 + $0x50] sm:$0xff]  }
   0x2   :  { %v930_v1 = vld [vmem:[%s1313_s1] sm:$0xff]   ;;  %801 = vmatprep.subr.bf16.mxu0 %v929_v0  ;;  %913 = vmatprep.subr.bf16.mxu1 %v929_v0  ;;  %v932_v3 = vld [vmem:[%s1313_s1 + $0x8] sm:$0xff]   ;;  %v934_v5 = vld [vmem:[%s1313_s1 + $0x10] sm:$0xff]  }
   0x3   :  { %802 = vmatpush3.bf16.msra.mxu0 %v930_v1  ;;  %921 = vmatpush3.bf16.msra.mxu1 %v930_v1  ;;  %v935_v6 = vld [vmem:[%s1313_s1 + $0x58] sm:$0xff]   ;;  %v937_v8 = vld [vmem:[%s1313_s1 + $0x60] sm:$0xff]   ;;  %v939_v10 = vld [vmem:[%s1313_s1 + $0x68] sm:$0xff]  }
   0x4   :  { %803 = vmatprep.subr.bf16.mxu0 %v931_v2  ;;  %914 = vmatprep.subr.bf16.mxu1 %v931_v2  ;;  %v936_v7 = vld [vmem:[%s1313_s1 + $0x18] sm:$0xff]   ;;  %v938_v9 = vld [vmem:[%s1313_s1 + $0x20] sm:$0xff]   ;;  %v940_v13 = vld [vmem:[%s1313_s1 + $0x28] sm:$0xff]  }
   0x5   :  { %v947_v11 = vld [vmem:[%s1314_s0 + $0x4] ss:$8 sps:$4 sm:$0xff]   ;;  %v941_v14 = vld [vmem:[%s1313_s1 + $0x70] sm:$0xff]   ;;  %v943_v16 = vld [vmem:[%s1313_s1 + $0x78] sm:$0xff]  }
   0x6   :  { %v950_v12 = vld [vmem:[%s1314_s0 + $0x84] ss:$8 sps:$4 sm:$0xff]   ;;  %370 = vmatprep.mubr.bf16.mxu0 %v947_v11  ;;  %v942_v15 = vld [vmem:[%s1313_s1 + $0x30] sm:$0xff]   ;;  %v944_v17 = vld [vmem:[%s1313_s1 + $0x38] sm:$0xff]  }
   0x7   :  { %804 = vmatpush3.bf16.msra.mxu0 %v932_v3  ;;  %922 = vmatpush3.bf16.msra.mxu1 %v932_v3  ;;  %v945_v18 = vld [vmem:[%s1314_s0] ss:$8 sps:$4 sm:$0xff]   ;;  %v951_v20 = vld [vmem:[%s1314_s0 + $0x14] ss:$8 sps:$4 sm:$0xff]   ;;  %v955_v22 = vld [vmem:[%s1314_s0 + $0x10] ss:$8 sps:$4 sm:$0xff]  }
   0x8   :  { %805 = vmatprep.subr.bf16.mxu0 %v933_v4  ;;  %915 = vmatprep.subr.bf16.mxu1 %v933_v4  ;;  %v948_v19 = vld [vmem:[%s1314_s0 + $0x80] ss:$8 sps:$4 sm:$0xff]   ;;  %v953_v21 = vld [vmem:[%s1314_s0 + $0x94] ss:$8 sps:$4 sm:$0xff]   ;;  %v956_v23 = vld [vmem:[%s1314_s0 + $0x90] ss:$8 sps:$4 sm:$0xff]  }
   0x9   :  { %434 = vmatprep.mubr.bf16.mxu1 %v950_v12  ;;  %v957_v24 = vld [vmem:[%s1314_s0 + $0x24] ss:$8 sps:$4 sm:$0xff]   ;;  %v961_v26 = vld [vmem:[%s1314_s0 + $0x20] ss:$8 sps:$4 sm:$0xff]   ;;  %v963_v28 = vld [vmem:[%s1314_s0 + $0x34] ss:$8 sps:$4 sm:$0xff]  }
   0xa   :  { %v959_v25 = vld [vmem:[%s1314_s0 + $0xa4] ss:$8 sps:$4 sm:$0xff]   ;;  %v962_v27 = vld [vmem:[%s1314_s0 + $0xa0] ss:$8 sps:$4 sm:$0xff]   ;;  %v965_v29 = vld [vmem:[%s1314_s0 + $0xb4] ss:$8 sps:$4 sm:$0xff]  }
   0xb   :  { %806 = vmatpush3.bf16.msra.mxu0 %v934_v5  ;;  %923 = vmatpush3.bf16.msra.mxu1 %v934_v5  ;;  %v967_v30 = vld [vmem:[%s1314_s0 + $0x30] ss:$8 sps:$4 sm:$0xff]   ;;  %v969_v32 = vld [vmem:[%s1314_s0 + $0x44] ss:$8 sps:$4 sm:$0xff]   ;;  %v973_v34 = vld [vmem:[%s1314_s0 + $0x40] ss:$8 sps:$4 sm:$0xff]  }
   0xc   :  { %807 = vmatprep.subr.bf16.mxu0 %v935_v6  ;;  %916 = vmatprep.subr.bf16.mxu1 %v935_v6  ;;  %v968_v31 = vld [vmem:[%s1314_s0 + $0xb0] ss:$8 sps:$4 sm:$0xff]   ;;  %v971_v33 = vld [vmem:[%s1314_s0 + $0xc4] ss:$8 sps:$4 sm:$0xff]   ;;  %v974_v35 = vld [vmem:[%s1314_s0 + $0xc0] ss:$8 sps:$4 sm:$0xff]  }
   0xd   :  { %v975_v36 = vld [vmem:[%s1314_s0 + $0x54] ss:$8 sps:$4 sm:$0xff]   ;;  %v979_v38 = vld [vmem:[%s1314_s0 + $0x50] ss:$8 sps:$4 sm:$0xff]   ;;  %v981_v40 = vld [vmem:[%s1314_s0 + $0x64] ss:$8 sps:$4 sm:$0xff]  }
   0xe   :  { %v977_v37 = vld [vmem:[%s1314_s0 + $0xd4] ss:$8 sps:$4 sm:$0xff]   ;;  %v980_v39 = vld [vmem:[%s1314_s0 + $0xd0] ss:$8 sps:$4 sm:$0xff]   ;;  %v983_v41 = vld [vmem:[%s1314_s0 + $0xe4] ss:$8 sps:$4 sm:$0xff]  }
   0xf   :  { %808 = vmatpush3.bf16.msra.mxu0 %v936_v7  ;;  %924 = vmatpush3.bf16.msra.mxu1 %v936_v7  ;;  %v45_v42 = vld [vmem:[%s1314_s0 + $0xf0] sm:$0xff]  ;;  %v985_v43 = vld [vmem:[%s1314_s0 + $0x60] ss:$8 sps:$4 sm:$0xff]  }
  0x10   :  { %809 = vmatprep.subr.bf16.mxu0 %v937_v8  ;;  %917 = vmatprep.subr.bf16.mxu1 %v937_v8  ;;  %v986_v44 = vld [vmem:[%s1314_s0 + $0xe0] ss:$8 sps:$4 sm:$0xff]   ;;  %v987_v45 = vld [vmem:[%s1314_s0 + $0x74] ss:$8 sps:$4 sm:$0xff]   ;;  %v722_v46 = vcombine.high %v45_v42, %v45_v42  ;;  %v990_v47 = vld [vmem:[%s1314_s0 + $0x70] ss:$8 sps:$4 sm:$0xff]   ;;  %v721_v48 = vcombine.low %v45_v42, %v45_v42 }
  0x11   :  { %v1156_v51 = vld [vmem:[%s1315_s2] ss:$0 sm:$0xff] }
  0x13   :  { %810 = vmatpush3.bf16.msra.mxu0 %v938_v9  ;;  %925 = vmatpush3.bf16.msra.mxu1 %v938_v9 }
  0x14   :  { %811 = vmatprep.subr.bf16.mxu0 %v939_v10  ;;  %918 = vmatprep.subr.bf16.mxu1 %v939_v10 }
  0x17   :  { %812 = vmatpush3.bf16.msra.mxu0 %v940_v13  ;;  %926 = vmatpush3.bf16.msra.mxu1 %v940_v13 }
  0x18   :  { %813 = vmatprep.subr.bf16.mxu0 %v941_v14  ;;  %919 = vmatprep.subr.bf16.mxu1 %v941_v14 }
  0x1b   :  { %814 = vmatpush3.bf16.msra.mxu0 %v942_v15  ;;  %927 = vmatpush3.bf16.msra.mxu1 %v942_v15 }
  0x1c   :  { %815 = vmatprep.subr.bf16.mxu0 %v943_v16  ;;  %920 = vmatprep.subr.bf16.mxu1 %v943_v16 }
  0x1f   :  { %816 = vmatpush3.bf16.msra.mxu0 %v944_v17  ;;  %928 = vmatpush3.bf16.msra.mxu1 %v944_v17 }
  0x22   :  { %371 = vmatmul.mubr.bf16.vlgmr.msra.gmra.mrb[0].mxu0 %v945_v18  ;;  %435 = vmatmul.mubr.bf16.vlgmr.msra.gmra.mrb[0].mxu1 %v948_v19 }
  0x23   :  { %378 = vmatprep.mubr.bf16.mxu0 %v951_v20  ;;  %442 = vmatprep.mubr.bf16.mxu1 %v953_v21 }
  0x2a   :  { %379 = vmatmul.mubr.bf16.gmra.mrb[4].mxu0 %v955_v22  ;;  %443 = vmatmul.mubr.bf16.gmra.mrb[4].mxu1 %v956_v23 }
  0x2b   :  { %386 = vmatprep.mubr.bf16.mxu0 %v957_v24  ;;  %450 = vmatprep.mubr.bf16.mxu1 %v959_v25 }
  0x32   :  { %387 = vmatmul.mubr.bf16.gmra.mrb[8].mxu0 %v961_v26  ;;  %451 = vmatmul.mubr.bf16.gmra.mrb[8].mxu1 %v962_v27 }
  0x33   :  { %394 = vmatprep.mubr.bf16.mxu0 %v963_v28  ;;  %458 = vmatprep.mubr.bf16.mxu1 %v965_v29 }
  0x3a   :  { %395 = vmatmul.mubr.bf16.gmra.mrb[12].mxu0 %v967_v30  ;;  %459 = vmatmul.mubr.bf16.gmra.mrb[12].mxu1 %v968_v31 }
  0x3b   :  { %402 = vmatprep.mubr.bf16.mxu0 %v969_v32  ;;  %466 = vmatprep.mubr.bf16.mxu1 %v971_v33 }
  0x42   :  { %403 = vmatmul.mubr.bf16.gmra.mrb[16].mxu0 %v973_v34  ;;  %467 = vmatmul.mubr.bf16.gmra.mrb[16].mxu1 %v974_v35 }
  0x43   :  { %410 = vmatprep.mubr.bf16.mxu0 %v975_v36  ;;  %474 = vmatprep.mubr.bf16.mxu1 %v977_v37 }
  0x4a   :  { %411 = vmatmul.mubr.bf16.gmra.mrb[20].mxu0 %v979_v38  ;;  %475 = vmatmul.mubr.bf16.gmra.mrb[20].mxu1 %v980_v39 }
  0x4b   :  { %418 = vmatprep.mubr.bf16.mxu0 %v981_v40  ;;  %482 = vmatprep.mubr.bf16.mxu1 %v983_v41 }
  0x52   :  { %419 = vmatmul.mubr.bf16.gmra.mrb[24].mxu0 %v985_v43  ;;  %483 = vmatmul.mubr.bf16.gmra.mrb[24].mxu1 %v986_v44 }
  0x53   :  { %426 = vmatprep.mubr.bf16.mxu0 %v987_v45  ;;  %490 = vmatprep.mubr.bf16.mxu1 %v722_v46 }
  0x5a   :  { %427 = vmatmul.mubr.bf16.gmra.mrb[28].mxu0 %v990_v47  ;;  %491 = vmatmul.mubr.bf16.gmra.mrb[28].mxu1 %v721_v48 }
  0xf5   :  { %v817_v49 = vpop.f32.mrb[0].mxu0  ;;  %v865_v50 = vpop.f32.mrb[0].mxu1 }
  0xf6   :  { %v818_v52 = vpop.f32.mrb[1].mxu0  ;;  %v866_v53 = vpop.f32.mrb[1].mxu1 }
  0xf7   :  { %v819_v54 = vadd.f32 %v818_v52, %v817_v49  ;;  %v867_v55 = vadd.f32 %v866_v53, %v865_v50  ;;  %v820_v56 = vpop.f32.mrb[2].mxu0  ;;  %v868_v57 = vpop.f32.mrb[2].mxu1 }
  0xf8   :  { %v821_v58 = vpop.f32.mrb[3].mxu0  ;;  %v869_v59 = vpop.f32.mrb[3].mxu1 }
  0xf9   :  { %v373_v60 = vadd.f32 %v819_v54, %v1156_v51  ;;  %v437_v61 = vadd.f32 %v867_v55, %v1156_v51  ;;  %v822_v62 = vadd.f32 %v821_v58, %v820_v56  ;;  %v870_v63 = vadd.f32 %v869_v59, %v868_v57 }
  0xfb   :  { %v498_v0 = vmax.f32 %v373_v60, 0.0  ;;  %v514_v1 = vmax.f32 %v437_v61, 0.0  ;;  %v376_v2 = vadd.f32 %v822_v62, %v1156_v51  ;;  %v440_v3 = vadd.f32 %v870_v63, %v1156_v51 }
  0xfd   :  { %v770_v4 = vpack.c.bf16 %v498_v0, %v498_v0  ;;  %v786_v5 = vpack.c.bf16 %v514_v1, %v514_v1  ;;  %v499_v6 = vmax.f32 %v376_v2, 0.0  ;;  %v515_v7 = vmax.f32 %v440_v3, 0.0  ;;  %v823_v8 = vpop.f32.mrb[4].mxu0  ;;  %v871_v9 = vpop.f32.mrb[4].mxu1 }
  0xfe   :  { %v824_v10 = vpop.f32.mrb[5].mxu0  ;;  %v872_v11 = vpop.f32.mrb[5].mxu1 }
  0xff   :  { %655 = vst.msk [vmem:[%s1316_s3] sm:$0xf] %vm654_vm0, %v770_v4  ;;  %671 = vst.msk [vmem:[%s1316_s3 + $0x40] sm:$0xf] %vm654_vm0, %v786_v5  ;;  %v771_v12 = vpack.c.bf16 %v499_v6, %v499_v6  ;;  %v787_v13 = vpack.c.bf16 %v515_v7, %v515_v7  ;;  %v825_v14 = vadd.f32 %v824_v10, %v823_v8  ;;  %v826_v16 = vpop.f32.mrb[6].mxu0  ;;  %v874_v17 = vpop.f32.mrb[6].mxu1 }
 0x100   :  { %v873_v15 = vadd.f32 %v872_v11, %v871_v9  ;;  %v827_v18 = vpop.f32.mrb[7].mxu0  ;;  %v875_v19 = vpop.f32.mrb[7].mxu1 }
 0x101   :  { %656 = vst.msk [vmem:[%s1316_s3 + $0x4] sm:$0xf] %vm654_vm0, %v771_v12  ;;  %672 = vst.msk [vmem:[%s1316_s3 + $0x44] sm:$0xf] %vm654_vm0, %v787_v13  ;;  %v381_v20 = vadd.f32 %v825_v14, %v1156_v51  ;;  %v828_v22 = vadd.f32 %v827_v18, %v826_v16  ;;  %v876_v23 = vadd.f32 %v875_v19, %v874_v17 }
 0x102   :  { %v445_v21 = vadd.f32 %v873_v15, %v1156_v51 }
 0x103   :  { %v500_v24 = vmax.f32 %v381_v20, 0.0  ;;  %v384_v26 = vadd.f32 %v828_v22, %v1156_v51  ;;  %v448_v27 = vadd.f32 %v876_v23, %v1156_v51 }
 0x104   :  { %v516_v25 = vmax.f32 %v445_v21, 0.0 }
 0x105   :  { %v772_v28 = vpack.c.bf16 %v500_v24, %v500_v24  ;;  %v501_v30 = vmax.f32 %v384_v26, 0.0  ;;  %v517_v31 = vmax.f32 %v448_v27, 0.0  ;;  %v829_v32 = vpop.f32.mrb[8].mxu0  ;;  %v877_v33 = vpop.f32.mrb[8].mxu1 }
 0x106   :  { %v788_v29 = vpack.c.bf16 %v516_v25, %v516_v25  ;;  %v830_v34 = vpop.f32.mrb[9].mxu0  ;;  %v878_v35 = vpop.f32.mrb[9].mxu1 }
 0x107   :  { %657 = vst.msk [vmem:[%s1316_s3 + $0x8] sm:$0xf] %vm654_vm0, %v772_v28  ;;  %v773_v36 = vpack.c.bf16 %v501_v30, %v501_v30  ;;  %v789_v37 = vpack.c.bf16 %v517_v31, %v517_v31  ;;  %v831_v38 = vadd.f32 %v830_v34, %v829_v32  ;;  %v879_v39 = vadd.f32 %v878_v35, %v877_v33  ;;  %v832_v40 = vpop.f32.mrb[10].mxu0  ;;  %v880_v41 = vpop.f32.mrb[10].mxu1 }
 0x108   :  { %673 = vst.msk [vmem:[%s1316_s3 + $0x48] sm:$0xf] %vm654_vm0, %v788_v29  ;;  %v833_v42 = vpop.f32.mrb[11].mxu0  ;;  %v881_v43 = vpop.f32.mrb[11].mxu1 }
 0x109   :  { %658 = vst.msk [vmem:[%s1316_s3 + $0xc] sm:$0xf] %vm654_vm0, %v773_v36  ;;  %674 = vst.msk [vmem:[%s1316_s3 + $0x4c] sm:$0xf] %vm654_vm0, %v789_v37  ;;  %v389_v44 = vadd.f32 %v831_v38, %v1156_v51  ;;  %v453_v45 = vadd.f32 %v879_v39, %v1156_v51  ;;  %v834_v46 = vadd.f32 %v833_v42, %v832_v40 }
 0x10a   :  { %v882_v47 = vadd.f32 %v881_v43, %v880_v41 }
 0x10b   :  { %v502_v48 = vmax.f32 %v389_v44, 0.0  ;;  %v518_v49 = vmax.f32 %v453_v45, 0.0  ;;  %v392_v50 = vadd.f32 %v834_v46, %v1156_v51 }
 0x10c   :  { %v456_v52 = vadd.f32 %v882_v47, %v1156_v51 }
 0x10d   :  { %v774_v53 = vpack.c.bf16 %v502_v48, %v502_v48  ;;  %v790_v54 = vpack.c.bf16 %v518_v49, %v518_v49  ;;  %v503_v55 = vmax.f32 %v392_v50, 0.0  ;;  %v835_v57 = vpop.f32.mrb[12].mxu0  ;;  %v883_v58 = vpop.f32.mrb[12].mxu1 }
 0x10e   :  { %v519_v56 = vmax.f32 %v456_v52, 0.0  ;;  %v836_v59 = vpop.f32.mrb[13].mxu0  ;;  %v884_v60 = vpop.f32.mrb[13].mxu1 }
 0x10f   :  { %659 = vst.msk [vmem:[%s1316_s3 + $0x10] sm:$0xf] %vm654_vm0, %v774_v53  ;;  %675 = vst.msk [vmem:[%s1316_s3 + $0x50] sm:$0xf] %vm654_vm0, %v790_v54  ;;  %v775_v61 = vpack.c.bf16 %v503_v55, %v503_v55  ;;  %v837_v63 = vadd.f32 %v836_v59, %v835_v57  ;;  %v885_v0 = vadd.f32 %v884_v60, %v883_v58  ;;  %v838_v1 = vpop.f32.mrb[14].mxu0  ;;  %v886_v2 = vpop.f32.mrb[14].mxu1 }
 0x110   :  { %v791_v62 = vpack.c.bf16 %v519_v56, %v519_v56  ;;  %v839_v3 = vpop.f32.mrb[15].mxu0  ;;  %v887_v4 = vpop.f32.mrb[15].mxu1 }
 0x111   :  { %660 = vst.msk [vmem:[%s1316_s3 + $0x14] sm:$0xf] %vm654_vm0, %v775_v61  ;;  %v397_v5 = vadd.f32 %v837_v63, %v1156_v51  ;;  %v461_v6 = vadd.f32 %v885_v0, %v1156_v51  ;;  %v840_v7 = vadd.f32 %v839_v3, %v838_v1  ;;  %v888_v8 = vadd.f32 %v887_v4, %v886_v2 }
 0x112   :  { %676 = vst.msk [vmem:[%s1316_s3 + $0x54] sm:$0xf] %vm654_vm0, %v791_v62 }
 0x113   :  { %v504_v9 = vmax.f32 %v397_v5, 0.0  ;;  %v520_v10 = vmax.f32 %v461_v6, 0.0  ;;  %v400_v11 = vadd.f32 %v840_v7, %v1156_v51  ;;  %v464_v12 = vadd.f32 %v888_v8, %v1156_v51 }
 0x115   :  { %v776_v13 = vpack.c.bf16 %v504_v9, %v504_v9  ;;  %v792_v14 = vpack.c.bf16 %v520_v10, %v520_v10  ;;  %v505_v15 = vmax.f32 %v400_v11, 0.0  ;;  %v521_v16 = vmax.f32 %v464_v12, 0.0  ;;  %v841_v17 = vpop.f32.mrb[16].mxu0  ;;  %v889_v18 = vpop.f32.mrb[16].mxu1 }
 0x116   :  { %v842_v19 = vpop.f32.mrb[17].mxu0  ;;  %v890_v20 = vpop.f32.mrb[17].mxu1 }
 0x117   :  { %661 = vst.msk [vmem:[%s1316_s3 + $0x18] sm:$0xf] %vm654_vm0, %v776_v13  ;;  %677 = vst.msk [vmem:[%s1316_s3 + $0x58] sm:$0xf] %vm654_vm0, %v792_v14  ;;  %v777_v21 = vpack.c.bf16 %v505_v15, %v505_v15  ;;  %v793_v22 = vpack.c.bf16 %v521_v16, %v521_v16  ;;  %v843_v23 = vadd.f32 %v842_v19, %v841_v17  ;;  %v844_v25 = vpop.f32.mrb[18].mxu0  ;;  %v892_v26 = vpop.f32.mrb[18].mxu1 }
 0x118   :  { %v891_v24 = vadd.f32 %v890_v20, %v889_v18  ;;  %v845_v27 = vpop.f32.mrb[19].mxu0  ;;  %v893_v28 = vpop.f32.mrb[19].mxu1 }
 0x119   :  { %662 = vst.msk [vmem:[%s1316_s3 + $0x1c] sm:$0xf] %vm654_vm0, %v777_v21  ;;  %678 = vst.msk [vmem:[%s1316_s3 + $0x5c] sm:$0xf] %vm654_vm0, %v793_v22  ;;  %v405_v29 = vadd.f32 %v843_v23, %v1156_v51  ;;  %v846_v31 = vadd.f32 %v845_v27, %v844_v25  ;;  %v894_v32 = vadd.f32 %v893_v28, %v892_v26 }
 0x11a   :  { %v469_v30 = vadd.f32 %v891_v24, %v1156_v51 }
 0x11b   :  { %v506_v33 = vmax.f32 %v405_v29, 0.0  ;;  %v408_v35 = vadd.f32 %v846_v31, %v1156_v51  ;;  %v472_v36 = vadd.f32 %v894_v32, %v1156_v51 }
 0x11c   :  { %v522_v34 = vmax.f32 %v469_v30, 0.0 }
 0x11d   :  { %v778_v37 = vpack.c.bf16 %v506_v33, %v506_v33  ;;  %v507_v39 = vmax.f32 %v408_v35, 0.0  ;;  %v523_v40 = vmax.f32 %v472_v36, 0.0  ;;  %v847_v41 = vpop.f32.mrb[20].mxu0  ;;  %v895_v42 = vpop.f32.mrb[20].mxu1 }
 0x11e   :  { %v794_v38 = vpack.c.bf16 %v522_v34, %v522_v34  ;;  %v848_v43 = vpop.f32.mrb[21].mxu0  ;;  %v896_v44 = vpop.f32.mrb[21].mxu1 }
 0x11f   :  { %663 = vst.msk [vmem:[%s1316_s3 + $0x20] sm:$0xf] %vm654_vm0, %v778_v37  ;;  %v779_v45 = vpack.c.bf16 %v507_v39, %v507_v39  ;;  %v795_v46 = vpack.c.bf16 %v523_v40, %v523_v40  ;;  %v849_v47 = vadd.f32 %v848_v43, %v847_v41  ;;  %v897_v48 = vadd.f32 %v896_v44, %v895_v42  ;;  %v850_v49 = vpop.f32.mrb[22].mxu0  ;;  %v898_v50 = vpop.f32.mrb[22].mxu1 }
 0x120   :  { %679 = vst.msk [vmem:[%s1316_s3 + $0x60] sm:$0xf] %vm654_vm0, %v794_v38  ;;  %v851_v52 = vpop.f32.mrb[23].mxu0  ;;  %v899_v53 = vpop.f32.mrb[23].mxu1 }
 0x121   :  { %664 = vst.msk [vmem:[%s1316_s3 + $0x24] sm:$0xf] %vm654_vm0, %v779_v45  ;;  %680 = vst.msk [vmem:[%s1316_s3 + $0x64] sm:$0xf] %vm654_vm0, %v795_v46  ;;  %v413_v54 = vadd.f32 %v849_v47, %v1156_v51  ;;  %v477_v55 = vadd.f32 %v897_v48, %v1156_v51  ;;  %v852_v56 = vadd.f32 %v851_v52, %v850_v49 }
 0x122   :  { %v900_v57 = vadd.f32 %v899_v53, %v898_v50 }
 0x123   :  { %v508_v58 = vmax.f32 %v413_v54, 0.0  ;;  %v524_v59 = vmax.f32 %v477_v55, 0.0  ;;  %v416_v60 = vadd.f32 %v852_v56, %v1156_v51 }
 0x124   :  { %v480_v61 = vadd.f32 %v900_v57, %v1156_v51 }
 0x125   :  { %v780_v62 = vpack.c.bf16 %v508_v58, %v508_v58  ;;  %v796_v63 = vpack.c.bf16 %v524_v59, %v524_v59  ;;  %v509_v0 = vmax.f32 %v416_v60, 0.0  ;;  %v853_v2 = vpop.f32.mrb[24].mxu0  ;;  %v901_v3 = vpop.f32.mrb[24].mxu1 }
 0x126   :  { %v525_v1 = vmax.f32 %v480_v61, 0.0  ;;  %v854_v4 = vpop.f32.mrb[25].mxu0  ;;  %v902_v5 = vpop.f32.mrb[25].mxu1 }
 0x127   :  { %665 = vst.msk [vmem:[%s1316_s3 + $0x28] sm:$0xf] %vm654_vm0, %v780_v62  ;;  %681 = vst.msk [vmem:[%s1316_s3 + $0x68] sm:$0xf] %vm654_vm0, %v796_v63  ;;  %v781_v6 = vpack.c.bf16 %v509_v0, %v509_v0  ;;  %v855_v8 = vadd.f32 %v854_v4, %v853_v2  ;;  %v903_v9 = vadd.f32 %v902_v5, %v901_v3  ;;  %v856_v10 = vpop.f32.mrb[26].mxu0  ;;  %v904_v11 = vpop.f32.mrb[26].mxu1 }
 0x128   :  { %v797_v7 = vpack.c.bf16 %v525_v1, %v525_v1  ;;  %v857_v12 = vpop.f32.mrb[27].mxu0  ;;  %v905_v13 = vpop.f32.mrb[27].mxu1 }
 0x129   :  { %666 = vst.msk [vmem:[%s1316_s3 + $0x2c] sm:$0xf] %vm654_vm0, %v781_v6  ;;  %v421_v14 = vadd.f32 %v855_v8, %v1156_v51  ;;  %v485_v15 = vadd.f32 %v903_v9, %v1156_v51  ;;  %v858_v16 = vadd.f32 %v857_v12, %v856_v10  ;;  %v906_v17 = vadd.f32 %v905_v13, %v904_v11 }
 0x12a   :  { %682 = vst.msk [vmem:[%s1316_s3 + $0x6c] sm:$0xf] %vm654_vm0, %v797_v7 }
 0x12b   :  { %v510_v18 = vmax.f32 %v421_v14, 0.0  ;;  %v526_v19 = vmax.f32 %v485_v15, 0.0  ;;  %v424_v20 = vadd.f32 %v858_v16, %v1156_v51  ;;  %v488_v21 = vadd.f32 %v906_v17, %v1156_v51 }
 0x12d   :  { %v782_v22 = vpack.c.bf16 %v510_v18, %v510_v18  ;;  %v798_v23 = vpack.c.bf16 %v526_v19, %v526_v19  ;;  %v511_v24 = vmax.f32 %v424_v20, 0.0  ;;  %v527_v25 = vmax.f32 %v488_v21, 0.0  ;;  %v859_v26 = vpop.f32.mrb[28].mxu0  ;;  %v907_v27 = vpop.f32.mrb[28].mxu1 }
 0x12e   :  { %v860_v28 = vpop.f32.mrb[29].mxu0  ;;  %v908_v29 = vpop.f32.mrb[29].mxu1 }
 0x12f   :  { %667 = vst.msk [vmem:[%s1316_s3 + $0x30] sm:$0xf] %vm654_vm0, %v782_v22  ;;  %683 = vst.msk [vmem:[%s1316_s3 + $0x70] sm:$0xf] %vm654_vm0, %v798_v23  ;;  %v783_v30 = vpack.c.bf16 %v511_v24, %v511_v24  ;;  %v799_v31 = vpack.c.bf16 %v527_v25, %v527_v25  ;;  %v861_v32 = vadd.f32 %v860_v28, %v859_v26  ;;  %v862_v34 = vpop.f32.mrb[30].mxu0  ;;  %v910_v35 = vpop.f32.mrb[30].mxu1 }
 0x130   :  { %v909_v33 = vadd.f32 %v908_v29, %v907_v27  ;;  %v863_v36 = vpop.f32.mrb[31].mxu0  ;;  %v911_v37 = vpop.f32.mrb[31].mxu1 }
 0x131   :  { %668 = vst.msk [vmem:[%s1316_s3 + $0x34] sm:$0xf] %vm654_vm0, %v783_v30  ;;  %684 = vst.msk [vmem:[%s1316_s3 + $0x74] sm:$0xf] %vm654_vm0, %v799_v31  ;;  %v429_v38 = vadd.f32 %v861_v32, %v1156_v51  ;;  %v864_v40 = vadd.f32 %v863_v36, %v862_v34 }
 0x132   :  { %v493_v39 = vadd.f32 %v909_v33, %v1156_v51 }
 0x133   :  { %v512_v41 = vmax.f32 %v429_v38, 0.0  ;;  %v432_v43 = vadd.f32 %v864_v40, %v1156_v51 }
 0x134   :  { %v528_v42 = vmax.f32 %v493_v39, 0.0 }
 0x135   :  { %v784_v44 = vpack.c.bf16 %v512_v41, %v512_v41  ;;  %v513_v46 = vmax.f32 %v432_v43, 0.0 }
 0x136   :  { %v800_v45 = vpack.c.bf16 %v528_v42, %v528_v42 }
 0x137   :  { %669 = vst.msk [vmem:[%s1316_s3 + $0x38] sm:$0xf] %vm654_vm0, %v784_v44  ;;  %v785_v47 = vpack.c.bf16 %v513_v46, %v513_v46 }
 0x138   :  { %685 = vst.msk [vmem:[%s1316_s3 + $0x78] sm:$0xf] %vm654_vm0, %v800_v45 }
 0x139   :  { %670 = vst.msk [vmem:[%s1316_s3 + $0x3c] sm:$0xf] %vm654_vm0, %v785_v47 }

// kernel: racing_net_forward.6
= control target key start
LH: loop header
LB: loop body
LE: loop exit
PB: predicated region body
PF: predicated region fallthrough
CT: control target
= control target key end

     0   :  { %vm444_vm0 = vcmask 519168   ;;  %s761_s1 = inlined_call_operand.vmem [shape: bf16[512,64], index: 1, kind: input, shape index: {}]   ;;  %s762_s0 = inlined_call_operand.vmem [shape: bf16[32,512], index: 0, kind: input, shape index: {}]   ;;  %s763_s2 = inlined_call_operand.vmem [shape: f32[1,64], index: 2, kind: input, shape index: {}]   ;;  %s764_s3 = inlined_call_operand.vmem [shape: bf16[32,64], index: 3, kind: output, shape index: {}]  }
   0x1   :  { %v558_v0 = vld [vmem:[%s761_s1 + $0x40] sm:$0xff]   ;;  %v562_v4 = vld [vmem:[%s761_s1 + $0x48] sm:$0xff]   ;;  %v566_v8 = vld [vmem:[%s761_s1 + $0x50] sm:$0xff]  }
   0x2   :  { %v559_v1 = vld [vmem:[%s761_s1 + $0xc0] sm:$0xff]   ;;  %502 = vmatprep.subr.bf16.mxu0 %v558_v0  ;;  %v563_v5 = vld [vmem:[%s761_s1 + $0xc8] sm:$0xff]   ;;  %v567_v9 = vld [vmem:[%s761_s1 + $0xd0] sm:$0xff]  }
   0x3   :  { %v560_v2 = vld [vmem:[%s761_s1] sm:$0xff]   ;;  %530 = vmatprep.subr.bf16.mxu1 %v559_v1  ;;  %v564_v6 = vld [vmem:[%s761_s1 + $0x8] sm:$0xff]   ;;  %v568_v10 = vld [vmem:[%s761_s1 + $0x10] sm:$0xff]  }
   0x4   :  { %v561_v3 = vld [vmem:[%s761_s1 + $0x80] sm:$0xff]   ;;  %503 = vmatpush3.bf16.msra.mxu0 %v560_v2  ;;  %v565_v7 = vld [vmem:[%s761_s1 + $0x88] sm:$0xff]   ;;  %v569_v11 = vld [vmem:[%s761_s1 + $0x90] sm:$0xff]  }
   0x5   :  { %531 = vmatpush3.bf16.msra.mxu1 %v561_v3  ;;  %504 = vmatprep.subr.bf16.mxu0 %v562_v4  ;;  %v570_v12 = vld [vmem:[%s761_s1 + $0x58] sm:$0xff]   ;;  %v574_v16 = vld [vmem:[%s761_s1 + $0x60] sm:$0xff]   ;;  %v578_v20 = vld [vmem:[%s761_s1 + $0x68] sm:$0xff]  }
   0x6   :  { %532 = vmatprep.subr.bf16.mxu1 %v563_v5  ;;  %v571_v13 = vld [vmem:[%s761_s1 + $0xd8] sm:$0xff]   ;;  %v575_v17 = vld [vmem:[%s761_s1 + $0xe0] sm:$0xff]   ;;  %v579_v21 = vld [vmem:[%s761_s1 + $0xe8] sm:$0xff]  }
   0x7   :  { %v572_v14 = vld [vmem:[%s761_s1 + $0x18] sm:$0xff]   ;;  %v576_v18 = vld [vmem:[%s761_s1 + $0x20] sm:$0xff]   ;;  %v580_v22 = vld [vmem:[%s761_s1 + $0x28] sm:$0xff]  }
   0x8   :  { %505 = vmatpush3.bf16.msra.mxu0 %v564_v6  ;;  %v573_v15 = vld [vmem:[%s761_s1 + $0x98] sm:$0xff]   ;;  %v577_v19 = vld [vmem:[%s761_s1 + $0xa0] sm:$0xff]   ;;  %v581_v23 = vld [vmem:[%s761_s1 + $0xa8] sm:$0xff]  }
   0x9   :  { %533 = vmatpush3.bf16.msra.mxu1 %v565_v7  ;;  %506 = vmatprep.subr.bf16.mxu0 %v566_v8  ;;  %v582_v24 = vld [vmem:[%s761_s1 + $0x70] sm:$0xff]   ;;  %v586_v28 = vld [vmem:[%s761_s1 + $0x78] sm:$0xff]   ;;  %v453_v42 = vld [vmem:[%s763_s2] ss:$0 sm:$0xff] }
   0xa   :  { %534 = vmatprep.subr.bf16.mxu1 %v567_v9  ;;  %v583_v25 = vld [vmem:[%s761_s1 + $0xf0] sm:$0xff]   ;;  %v587_v29 = vld [vmem:[%s761_s1 + $0xf8] sm:$0xff]  }
   0xb   :  { %v584_v26 = vld [vmem:[%s761_s1 + $0x30] sm:$0xff]   ;;  %v588_v30 = vld [vmem:[%s761_s1 + $0x38] sm:$0xff]  }
   0xc   :  { %507 = vmatpush3.bf16.msra.mxu0 %v568_v10  ;;  %v585_v27 = vld [vmem:[%s761_s1 + $0xb0] sm:$0xff]   ;;  %v589_v31 = vld [vmem:[%s761_s1 + $0xb8] sm:$0xff]  }
   0xd   :  { %535 = vmatpush3.bf16.msra.mxu1 %v569_v11  ;;  %508 = vmatprep.subr.bf16.mxu0 %v570_v12  ;;  %v590_v32 = vld [vmem:[%s762_s0] ss:$16 sps:$4 sm:$0xff]   ;;  %v592_v33 = vld [vmem:[%s762_s0 + $0x4] ss:$16 sps:$4 sm:$0xff]   ;;  %v593_v34 = vld [vmem:[%s762_s0 + $0x8] ss:$16 sps:$4 sm:$0xff]  }
   0xe   :  { %536 = vmatprep.subr.bf16.mxu1 %v571_v13  ;;  %v595_v35 = vld [vmem:[%s762_s0 + $0xc] ss:$16 sps:$4 sm:$0xff]   ;;  %358 = vmatprep.mubr.bf16.mxu0 %v592_v33  ;;  %v596_v36 = vld [vmem:[%s762_s0 + $0x24] ss:$16 sps:$4 sm:$0xff]   ;;  %v600_v38 = vld [vmem:[%s762_s0 + $0x20] ss:$16 sps:$4 sm:$0xff]  }
   0xf   :  { %407 = vmatprep.mubr.bf16.mxu1 %v595_v35  ;;  %v598_v37 = vld [vmem:[%s762_s0 + $0x2c] ss:$16 sps:$4 sm:$0xff]   ;;  %v601_v39 = vld [vmem:[%s762_s0 + $0x28] ss:$16 sps:$4 sm:$0xff]  }
  0x10   :  { %509 = vmatpush3.bf16.msra.mxu0 %v572_v14 }
  0x11   :  { %537 = vmatpush3.bf16.msra.mxu1 %v573_v15  ;;  %510 = vmatprep.subr.bf16.mxu0 %v574_v16 }
  0x12   :  { %538 = vmatprep.subr.bf16.mxu1 %v575_v17 }
  0x14   :  { %511 = vmatpush3.bf16.msra.mxu0 %v576_v18 }
  0x15   :  { %539 = vmatpush3.bf16.msra.mxu1 %v577_v19  ;;  %512 = vmatprep.subr.bf16.mxu0 %v578_v20 }
  0x16   :  { %540 = vmatprep.subr.bf16.mxu1 %v579_v21 }
  0x18   :  { %513 = vmatpush3.bf16.msra.mxu0 %v580_v22 }
  0x19   :  { %541 = vmatpush3.bf16.msra.mxu1 %v581_v23  ;;  %514 = vmatprep.subr.bf16.mxu0 %v582_v24 }
  0x1a   :  { %542 = vmatprep.subr.bf16.mxu1 %v583_v25 }
  0x1c   :  { %515 = vmatpush3.bf16.msra.mxu0 %v584_v26 }
  0x1d   :  { %543 = vmatpush3.bf16.msra.mxu1 %v585_v27  ;;  %516 = vmatprep.subr.bf16.mxu0 %v586_v28 }
  0x1e   :  { %544 = vmatprep.subr.bf16.mxu1 %v587_v29 }
  0x20   :  { %517 = vmatpush3.bf16.msra.mxu0 %v588_v30 }
  0x21   :  { %545 = vmatpush3.bf16.msra.mxu1 %v589_v31 }
  0x23   :  { %359 = vmatmul.mubr.bf16.vlgmr.msra.gmra.mrb[0].mxu0 %v590_v32 }
  0x24   :  { %408 = vmatmul.mubr.bf16.vlgmr.msra.gmra.mrb[0].mxu1 %v593_v34  ;;  %366 = vmatprep.mubr.bf16.mxu0 %v596_v36 }
  0x25   :  { %415 = vmatprep.mubr.bf16.mxu1 %v598_v37 }
  0x2b   :  { %367 = vmatmul.mubr.bf16.gmra.mrb[4].mxu0 %v600_v38 }
  0x2c   :  { %416 = vmatmul.mubr.bf16.gmra.mrb[4].mxu1 %v601_v39 }
  0xf6   :  { %v518_v40 = vpop.f32.mrb[0].mxu0 }
  0xf7   :  { %v546_v41 = vpop.f32.mrb[0].mxu1  ;;  %v519_v43 = vpop.f32.mrb[1].mxu0 }
  0xf8   :  { %v520_v44 = vadd.f32 %v519_v43, %v518_v40  ;;  %v547_v45 = vpop.f32.mrb[1].mxu1  ;;  %v521_v46 = vpop.f32.mrb[2].mxu0 }
  0xf9   :  { %v548_v47 = vadd.f32 %v547_v45, %v546_v41  ;;  %v549_v48 = vpop.f32.mrb[2].mxu1  ;;  %v522_v49 = vpop.f32.mrb[3].mxu0 }
  0xfa   :  { %v361_v50 = vadd.f32 %v520_v44, %v453_v42  ;;  %v523_v51 = vadd.f32 %v522_v49, %v521_v46  ;;  %v550_v52 = vpop.f32.mrb[3].mxu1 }
  0xfb   :  { %v551_v53 = vadd.f32 %v550_v52, %v549_v48 }
  0xfc   :  { %v410_v54 = vadd.f32 %v548_v47, %v361_v50  ;;  %v364_v55 = vadd.f32 %v523_v51, %v453_v42 }
  0xfe   :  { %v424_v56 = vmax.f32 %v410_v54, 0.0  ;;  %v413_v57 = vadd.f32 %v551_v53, %v364_v55  ;;  %v524_v58 = vpop.f32.mrb[4].mxu0 }
  0xff   :  { %v552_v59 = vpop.f32.mrb[4].mxu1  ;;  %v525_v60 = vpop.f32.mrb[5].mxu0 }
 0x100   :  { %v498_v61 = vpack.c.bf16 %v424_v56, %v424_v56  ;;  %v425_v62 = vmax.f32 %v413_v57, 0.0  ;;  %v526_v63 = vadd.f32 %v525_v60, %v524_v58  ;;  %v553_v0 = vpop.f32.mrb[5].mxu1  ;;  %v527_v1 = vpop.f32.mrb[6].mxu0 }
 0x101   :  { %v554_v2 = vadd.f32 %v553_v0, %v552_v59  ;;  %v555_v3 = vpop.f32.mrb[6].mxu1  ;;  %v528_v4 = vpop.f32.mrb[7].mxu0 }
 0x102   :  { %445 = vst.msk [vmem:[%s764_s3] sm:$0xf] %vm444_vm0, %v498_v61  ;;  %v499_v5 = vpack.c.bf16 %v425_v62, %v425_v62  ;;  %v369_v6 = vadd.f32 %v526_v63, %v453_v42  ;;  %v529_v7 = vadd.f32 %v528_v4, %v527_v1  ;;  %v556_v8 = vpop.f32.mrb[7].mxu1 }
 0x103   :  { %v557_v9 = vadd.f32 %v556_v8, %v555_v3 }
 0x104   :  { %446 = vst.msk [vmem:[%s764_s3 + $0x4] sm:$0xf] %vm444_vm0, %v499_v5  ;;  %v418_v10 = vadd.f32 %v554_v2, %v369_v6  ;;  %v372_v11 = vadd.f32 %v529_v7, %v453_v42 }
 0x106   :  { %v426_v12 = vmax.f32 %v418_v10, 0.0  ;;  %v421_v13 = vadd.f32 %v557_v9, %v372_v11 }
 0x108   :  { %v500_v14 = vpack.c.bf16 %v426_v12, %v426_v12  ;;  %v427_v15 = vmax.f32 %v421_v13, 0.0 }
 0x10a   :  { %447 = vst.msk [vmem:[%s764_s3 + $0x8] sm:$0xf] %vm444_vm0, %v500_v14  ;;  %v501_v16 = vpack.c.bf16 %v427_v15, %v427_v15 }
 0x10c   :  { %448 = vst.msk [vmem:[%s764_s3 + $0xc] sm:$0xf] %vm444_vm0, %v501_v16 }

// kernel: racing_net_forward.8
= control target key start
LH: loop header
LB: loop body
LE: loop exit
PB: predicated region body
PF: predicated region fallthrough
CT: control target
= control target key end

     0   :  { %s928_s1 = inlined_call_operand.vmem [shape: bf16[256,512], index: 1, kind: input, shape index: {}]   ;;  %s929_s0 = inlined_call_operand.vmem [shape: bf16[8,256], index: 0, kind: input, shape index: {}]   ;;  %s930_s2 = inlined_call_operand.vmem [shape: f32[1,512], index: 2, kind: input, shape index: {}]   ;;  %s931_s3 = inlined_call_operand.vmem [shape: bf16[8,512], index: 3, kind: output, shape index: {}]  }
   0x1   :  { %v606_v0 = vld [vmem:[%s928_s1 + $0x4] ss:$16 sps:$4 sm:$0xff]   ;;  %v608_v1 = vld [vmem:[%s928_s1 + $0xc] ss:$16 sps:$4 sm:$0xff]   ;;  %v610_v2 = vld [vmem:[%s928_s1] ss:$16 sps:$4 sm:$0xff]  }
   0x2   :  { %428 = vmatprep.subr.bf16.mxu0 %v606_v0  ;;  %v611_v3 = vld [vmem:[%s928_s1 + $0x8] ss:$16 sps:$4 sm:$0xff]   ;;  %469 = vmatprep.subr.bf16.mxu1 %v608_v1  ;;  %v612_v4 = vld [vmem:[%s928_s1 + $0x24] ss:$16 sps:$4 sm:$0xff]   ;;  %v614_v5 = vld [vmem:[%s928_s1 + $0x2c] ss:$16 sps:$4 sm:$0xff]  }
   0x3   :  { %429 = vmatpush1.bf16.msra.mxu0 %v610_v2  ;;  %470 = vmatpush1.bf16.msra.mxu1 %v611_v3  ;;  %v616_v6 = vld [vmem:[%s928_s1 + $0x20] ss:$16 sps:$4 sm:$0xff]   ;;  %v617_v7 = vld [vmem:[%s928_s1 + $0x28] ss:$16 sps:$4 sm:$0xff]   ;;  %v618_v8 = vld [vmem:[%s928_s1 + $0x44] ss:$16 sps:$4 sm:$0xff]   ;;  %v81_v3 = vlaneseq }
   0x4   :  { %430 = vmatprep.subr.bf16.mxu0 %v612_v4  ;;  %471 = vmatprep.subr.bf16.mxu1 %v614_v5  ;;  %v620_v9 = vld [vmem:[%s928_s1 + $0x4c] ss:$16 sps:$4 sm:$0xff]   ;;  %v622_v10 = vld [vmem:[%s928_s1 + $0x40] ss:$16 sps:$4 sm:$0xff]   ;;  %v623_v11 = vld [vmem:[%s928_s1 + $0x48] ss:$16 sps:$4 sm:$0xff]  }
   0x5   :  { %v624_v12 = vld [vmem:[%s928_s1 + $0x64] ss:$16 sps:$4 sm:$0xff]   ;;  %v626_v13 = vld [vmem:[%s928_s1 + $0x6c] ss:$16 sps:$4 sm:$0xff]   ;;  %v628_v14 = vld [vmem:[%s928_s1 + $0x60] ss:$16 sps:$4 sm:$0xff]  }
   0x6   :  { %v629_v15 = vld [vmem:[%s928_s1 + $0x68] ss:$16 sps:$4 sm:$0xff]   ;;  %v630_v16 = vld [vmem:[%s928_s1 + $0x84] ss:$16 sps:$4 sm:$0xff]   ;;  %v632_v17 = vld [vmem:[%s928_s1 + $0x8c] ss:$16 sps:$4 sm:$0xff]  }
   0x7   :  { %431 = vmatpush1.bf16.msra.mxu0 %v616_v6  ;;  %472 = vmatpush1.bf16.msra.mxu1 %v617_v7  ;;  %v634_v18 = vld [vmem:[%s928_s1 + $0x80] ss:$16 sps:$4 sm:$0xff]   ;;  %v635_v19 = vld [vmem:[%s928_s1 + $0x88] ss:$16 sps:$4 sm:$0xff]   ;;  %v636_v20 = vld [vmem:[%s928_s1 + $0xa4] ss:$16 sps:$4 sm:$0xff]  }
   0x8   :  { %432 = vmatprep.subr.bf16.mxu0 %v618_v8  ;;  %473 = vmatprep.subr.bf16.mxu1 %v620_v9  ;;  %v638_v21 = vld [vmem:[%s928_s1 + $0xac] ss:$16 sps:$4 sm:$0xff]   ;;  %v640_v22 = vld [vmem:[%s928_s1 + $0xa0] ss:$16 sps:$4 sm:$0xff]   ;;  %v641_v23 = vld [vmem:[%s928_s1 + $0xa8] ss:$16 sps:$4 sm:$0xff]  }
   0x9   :  { %v642_v24 = vld [vmem:[%s928_s1 + $0xc4] ss:$16 sps:$4 sm:$0xff]   ;;  %v644_v25 = vld [vmem:[%s928_s1 + $0xcc] ss:$16 sps:$4 sm:$0xff]   ;;  %v646_v26 = vld [vmem:[%s928_s1 + $0xc0] ss:$16 sps:$4 sm:$0xff]  }
   0xa   :  { %v647_v27 = vld [vmem:[%s928_s1 + $0xc8] ss:$16 sps:$4 sm:$0xff]   ;;  %v648_v28 = vld [vmem:[%s928_s1 + $0xe4] ss:$16 sps:$4 sm:$0xff]   ;;  %v650_v29 = vld [vmem:[%s928_s1 + $0xec] ss:$16 sps:$4 sm:$0xff]  }
   0xb   :  { %433 = vmatpush1.bf16.msra.mxu0 %v622_v10  ;;  %474 = vmatpush1.bf16.msra.mxu1 %v623_v11  ;;  %v652_v30 = vld [vmem:[%s928_s1 + $0xe0] ss:$16 sps:$4 sm:$0xff]   ;;  %v653_v31 = vld [vmem:[%s928_s1 + $0xe8] ss:$16 sps:$4 sm:$0xff]   ;;  %v654_v32 = vld [vmem:[%s928_s1 + $0x104] ss:$16 sps:$4 sm:$0xff]  }
   0xc   :  { %434 = vmatprep.subr.bf16.mxu0 %v624_v12  ;;  %475 = vmatprep.subr.bf16.mxu1 %v626_v13  ;;  %v656_v33 = vld [vmem:[%s928_s1 + $0x10c] ss:$16 sps:$4 sm:$0xff]   ;;  %v658_v34 = vld [vmem:[%s928_s1 + $0x100] ss:$16 sps:$4 sm:$0xff]   ;;  %v659_v35 = vld [vmem:[%s928_s1 + $0x108] ss:$16 sps:$4 sm:$0xff]  }
   0xd   :  { %v660_v36 = vld [vmem:[%s928_s1 + $0x124] ss:$16 sps:$4 sm:$0xff]   ;;  %v662_v37 = vld [vmem:[%s928_s1 + $0x12c] ss:$16 sps:$4 sm:$0xff]   ;;  %v664_v38 = vld [vmem:[%s928_s1 + $0x120] ss:$16 sps:$4 sm:$0xff]  }
   0xe   :  { %v665_v39 = vld [vmem:[%s928_s1 + $0x128] ss:$16 sps:$4 sm:$0xff]   ;;  %v666_v40 = vld [vmem:[%s928_s1 + $0x144] ss:$16 sps:$4 sm:$0xff]   ;;  %v668_v41 = vld [vmem:[%s928_s1 + $0x14c] ss:$16 sps:$4 sm:$0xff]  }
   0xf   :  { %435 = vmatpush1.bf16.msra.mxu0 %v628_v14  ;;  %476 = vmatpush1.bf16.msra.mxu1 %v629_v15  ;;  %v670_v42 = vld [vmem:[%s928_s1 + $0x140] ss:$16 sps:$4 sm:$0xff]   ;;  %v671_v43 = vld [vmem:[%s928_s1 + $0x148] ss:$16 sps:$4 sm:$0xff]   ;;  %v672_v44 = vld [vmem:[%s928_s1 + $0x164] ss:$16 sps:$4 sm:$0xff]  }
  0x10   :  { %436 = vmatprep.subr.bf16.mxu0 %v630_v16  ;;  %477 = vmatprep.subr.bf16.mxu1 %v632_v17  ;;  %v674_v45 = vld [vmem:[%s928_s1 + $0x16c] ss:$16 sps:$4 sm:$0xff]   ;;  %v14_v46 = vld [vmem:[%s929_s0] sm:$0xff]  ;;  %v677_v49 = vld [vmem:[%s928_s1 + $0x168] ss:$16 sps:$4 sm:$0xff]   ;;  %v82_v4 = vshrl.u32 %v81_v3, 7 }
  0x11   :  { %v537_v47 = vcombine.high %v14_v46, %v14_v46  ;;  %v676_v48 = vld [vmem:[%s928_s1 + $0x160] ss:$16 sps:$4 sm:$0xff]   ;;  %v678_v50 = vld [vmem:[%s928_s1 + $0x184] ss:$16 sps:$4 sm:$0xff]   ;;  %v680_v51 = vld [vmem:[%s928_s1 + $0x18c] ss:$16 sps:$4 sm:$0xff]   ;;  %v536_v2 = vcombine.low %v14_v46, %v14_v46 }
  0x12   :  { %v682_v52 = vld [vmem:[%s928_s1 + $0x180] ss:$16 sps:$4 sm:$0xff]   ;;  %v683_v53 = vld [vmem:[%s928_s1 + $0x188] ss:$16 sps:$4 sm:$0xff]   ;;  %v684_v54 = vld [vmem:[%s928_s1 + $0x1a4] ss:$16 sps:$4 sm:$0xff]  }
  0x13   :  { %437 = vmatpush1.bf16.msra.mxu0 %v634_v18  ;;  %478 = vmatpush1.bf16.msra.mxu1 %v635_v19  ;;  %v686_v55 = vld [vmem:[%s928_s1 + $0x1ac] ss:$16 sps:$4 sm:$0xff]   ;;  %v688_v56 = vld [vmem:[%s928_s1 + $0x1a0] ss:$16 sps:$4 sm:$0xff]   ;;  %v689_v57 = vld [vmem:[%s928_s1 + $0x1a8] ss:$16 sps:$4 sm:$0xff]  }
  0x14   :  { %438 = vmatprep.subr.bf16.mxu0 %v636_v20  ;;  %479 = vmatprep.subr.bf16.mxu1 %v638_v21  ;;  %v690_v58 = vld [vmem:[%s928_s1 + $0x1c4] ss:$16 sps:$4 sm:$0xff]   ;;  %v692_v59 = vld [vmem:[%s928_s1 + $0x1cc] ss:$16 sps:$4 sm:$0xff]   ;;  %v694_v60 = vld [vmem:[%s928_s1 + $0x1c0] ss:$16 sps:$4 sm:$0xff]  }
  0x15   :  { %460 = vmatprep.mubr.bf16.mxu0 %v537_v47  ;;  %501 = vmatprep.mubr.bf16.mxu1 %v537_v47  ;;  %v695_v61 = vld [vmem:[%s928_s1 + $0x1c8] ss:$16 sps:$4 sm:$0xff]   ;;  %v696_v62 = vld [vmem:[%s928_s1 + $0x1e4] ss:$16 sps:$4 sm:$0xff]   ;;  %v698_v63 = vld [vmem:[%s928_s1 + $0x1ec] ss:$16 sps:$4 sm:$0xff]  }
  0x16   :  { %v700_v0 = vld [vmem:[%s928_s1 + $0x1e0] ss:$16 sps:$4 sm:$0xff]   ;;  %v701_v1 = vld [vmem:[%s928_s1 + $0x1e8] ss:$16 sps:$4 sm:$0xff]   ;;  %v83_v5 = vsub.s32 0, %v82_v4  ;;  %v91_v6 = vsub.s32 2, %v82_v4 }
  0x17   :  { %439 = vmatpush1.bf16.msra.mxu0 %v640_v22  ;;  %480 = vmatpush1.bf16.msra.mxu1 %v641_v23  ;;  %v79_v7 = vld [vmem:[%s930_s2] sm:$0xf]  ;;  %v87_v8 = vsub.s32 1, %v82_v4  ;;  %v95_v9 = vsub.s32 3, %v82_v4 }
  0x18   :  { %440 = vmatprep.subr.bf16.mxu0 %v642_v24  ;;  %481 = vmatprep.subr.bf16.mxu1 %v644_v25  ;;  %v84_v10 = vrot.slane %v79_v7, %v83_v5  ;;  %v92_v11 = vrot.slane %v79_v7, %v91_v6 }
  0x19   :  { %v88_v12 = vrot.slane %v79_v7, %v87_v8  ;;  %v96_v13 = vrot.slane %v79_v7, %v95_v9 }
  0x1b   :  { %441 = vmatpush1.bf16.msra.mxu0 %v646_v26  ;;  %482 = vmatpush1.bf16.msra.mxu1 %v647_v27 }
  0x1c   :  { %442 = vmatprep.subr.bf16.mxu0 %v648_v28  ;;  %483 = vmatprep.subr.bf16.mxu1 %v650_v29 }
  0x1f   :  { %443 = vmatpush1.bf16.msra.mxu0 %v652_v30  ;;  %484 = vmatpush1.bf16.msra.mxu1 %v653_v31 }
  0x20   :  { %444 = vmatprep.subr.bf16.mxu0 %v654_v32  ;;  %485 = vmatprep.subr.bf16.mxu1 %v656_v33 }
  0x23   :  { %445 = vmatpush1.bf16.msra.mxu0 %v658_v34  ;;  %486 = vmatpush1.bf16.msra.mxu1 %v659_v35 }
  0x24   :  { %446 = vmatprep.subr.bf16.mxu0 %v660_v36  ;;  %487 = vmatprep.subr.bf16.mxu1 %v662_v37 }
  0x27   :  { %447 = vmatpush1.bf16.msra.mxu0 %v664_v38  ;;  %488 = vmatpush1.bf16.msra.mxu1 %v665_v39 }
  0x28   :  { %448 = vmatprep.subr.bf16.mxu0 %v666_v40  ;;  %489 = vmatprep.subr.bf16.mxu1 %v668_v41 }
  0x2b   :  { %449 = vmatpush1.bf16.msra.mxu0 %v670_v42  ;;  %490 = vmatpush1.bf16.msra.mxu1 %v671_v43 }
  0x2c   :  { %450 = vmatprep.subr.bf16.mxu0 %v672_v44  ;;  %491 = vmatprep.subr.bf16.mxu1 %v674_v45 }
  0x2f   :  { %451 = vmatpush1.bf16.msra.mxu0 %v676_v48  ;;  %492 = vmatpush1.bf16.msra.mxu1 %v677_v49 }
  0x30   :  { %452 = vmatprep.subr.bf16.mxu0 %v678_v50  ;;  %493 = vmatprep.subr.bf16.mxu1 %v680_v51 }
  0x33   :  { %453 = vmatpush1.bf16.msra.mxu0 %v682_v52  ;;  %494 = vmatpush1.bf16.msra.mxu1 %v683_v53 }
  0x34   :  { %454 = vmatprep.subr.bf16.mxu0 %v684_v54  ;;  %495 = vmatprep.subr.bf16.mxu1 %v686_v55 }
  0x37   :  { %455 = vmatpush1.bf16.msra.mxu0 %v688_v56  ;;  %496 = vmatpush1.bf16.msra.mxu1 %v689_v57 }
  0x38   :  { %456 = vmatprep.subr.bf16.mxu0 %v690_v58  ;;  %497 = vmatprep.subr.bf16.mxu1 %v692_v59 }
  0x3b   :  { %457 = vmatpush1.bf16.msra.mxu0 %v694_v60  ;;  %498 = vmatpush1.bf16.msra.mxu1 %v695_v61 }
  0x3c   :  { %458 = vmatprep.subr.bf16.mxu0 %v696_v62  ;;  %499 = vmatprep.subr.bf16.mxu1 %v698_v63 }
  0x3f   :  { %459 = vmatpush1.bf16.msra.mxu0 %v700_v0  ;;  %500 = vmatpush1.bf16.msra.mxu1 %v701_v1 }
  0x42   :  { %461 = vmatmul.mubr.bf16.vlgmr.msra.gmra.mrb[0].mxu0 %v536_v2  ;;  %502 = vmatmul.mubr.bf16.vlgmr.msra.gmra.mrb[0].mxu1 %v536_v2 }
 0x115   :  { %v462_v14 = vpop.f32.mrb[0].mxu0  ;;  %v503_v15 = vpop.f32.mrb[0].mxu1 }
 0x116   :  { %v463_v16 = vadd.f32 %v462_v14, %v84_v10  ;;  %v504_v17 = vadd.f32 %v503_v15, %v92_v11  ;;  %v464_v18 = vpop.f32.mrb[1].mxu0  ;;  %v505_v19 = vpop.f32.mrb[1].mxu1 }
 0x117   :  { %v465_v20 = vadd.f32 %v464_v18, %v88_v12  ;;  %v506_v21 = vadd.f32 %v505_v19, %v96_v13  ;;  %v466_v22 = vpop.f32.mrb[2].mxu0  ;;  %v507_v23 = vpop.f32.mrb[2].mxu1 }
 0x118   :  { %v510_v24 = vmax.f32 %v463_v16, 0.0  ;;  %v512_v25 = vmax.f32 %v504_v17, 0.0  ;;  %v467_v26 = vpop.f32.mrb[3].mxu0  ;;  %v508_v27 = vpop.f32.mrb[3].mxu1 }
 0x119   :  { %v511_v28 = vmax.f32 %v465_v20, 0.0  ;;  %v513_v29 = vmax.f32 %v506_v21, 0.0 }
 0x11b   :  { %v604_v30 = vpack.c.bf16 %v511_v28, %v510_v24  ;;  %v605_v31 = vpack.c.bf16 %v513_v29, %v512_v25 }
 0x11d   :  { %530 = vst [vmem:[%s931_s3] sm:$0xff] %v604_v30  ;;  %531 = vst [vmem:[%s931_s3 + $0x8] sm:$0xff] %v605_v31 }

// kernel: racing_net_forward.7
= control target key start
LH: loop header
LB: loop body
LE: loop exit
PB: predicated region body
PF: predicated region fallthrough
CT: control target
= control target key end

     0   :  { %v609_v35 = vmov 0.0   ;;  %vm610_vm0 = vmmov 0   ;;  %vm330_vm1 = vcmask 523264   ;;  %vm456_vm2 = vcmask 519168   ;;  %s754_s1 = inlined_call_operand.vmem [shape: bf16[576,64], index: 1, kind: input, shape index: {}]   ;;  %s755_s0 = inlined_call_operand.vmem [shape: bf16[8,576], index: 0, kind: input, shape index: {}]   ;;  %s756_s2 = inlined_call_operand.vmem [shape: f32[1,64], index: 2, kind: input, shape index: {}]   ;;  %s757_s3 = inlined_call_operand.vmem [shape: bf16[8,64], index: 3, kind: output, shape index: {}]  }
   0x1   :  { %v568_v0 = vld [vmem:[%s754_s1 + $0x40] sm:$0xff]   ;;  %v572_v4 = vld [vmem:[%s754_s1 + $0x48] sm:$0xff]   ;;  %v576_v8 = vld [vmem:[%s754_s1 + $0x50] sm:$0xff]  }
   0x2   :  { %v569_v1 = vld [vmem:[%s754_s1] sm:$0xff]   ;;  %505 = vmatprep.subr.bf16.mxu0 %v568_v0  ;;  %v573_v5 = vld [vmem:[%s754_s1 + $0x8] sm:$0xff]   ;;  %v577_v9 = vld [vmem:[%s754_s1 + $0x10] sm:$0xff]  }
   0x3   :  { %v570_v2 = vld [vmem:[%s754_s1 + $0xc0] sm:$0xff]   ;;  %506 = vmatpush3.bf16.msra.mxu0 %v569_v1  ;;  %v574_v6 = vld [vmem:[%s754_s1 + $0xc8] sm:$0xff]   ;;  %v578_v10 = vld [vmem:[%s754_s1 + $0xd0] sm:$0xff]  }
   0x4   :  { %v571_v3 = vld [vmem:[%s754_s1 + $0x80] sm:$0xff]   ;;  %527 = vmatprep.subr.bf16.mxu1 %v570_v2  ;;  %507 = vmatprep.subr.bf16.mxu0 %v572_v4  ;;  %v575_v7 = vld [vmem:[%s754_s1 + $0x88] sm:$0xff]   ;;  %v579_v11 = vld [vmem:[%s754_s1 + $0x90] sm:$0xff]  }
   0x5   :  { %528 = vmatpush3.bf16.msra.mxu1 %v571_v3  ;;  %v580_v12 = vld [vmem:[%s754_s1 + $0x58] sm:$0xff]   ;;  %v584_v16 = vld [vmem:[%s754_s1 + $0x60] sm:$0xff]   ;;  %v588_v20 = vld [vmem:[%s754_s1 + $0x68] sm:$0xff]  }
   0x6   :  { %529 = vmatprep.subr.bf16.mxu1 %v574_v6  ;;  %v581_v13 = vld [vmem:[%s754_s1 + $0x18] sm:$0xff]   ;;  %v585_v17 = vld [vmem:[%s754_s1 + $0x20] sm:$0xff]   ;;  %v589_v21 = vld [vmem:[%s754_s1 + $0x28] sm:$0xff]  }
   0x7   :  { %508 = vmatpush3.bf16.msra.mxu0 %v573_v5  ;;  %v582_v14 = vld [vmem:[%s754_s1 + $0xd8] sm:$0xff]   ;;  %v586_v18 = vld [vmem:[%s754_s1 + $0xe0] sm:$0xff]   ;;  %v590_v22 = vld [vmem:[%s754_s1 + $0xe8] sm:$0xff]  }
   0x8   :  { %509 = vmatprep.subr.bf16.mxu0 %v576_v8  ;;  %v583_v15 = vld [vmem:[%s754_s1 + $0x98] sm:$0xff]   ;;  %v587_v19 = vld [vmem:[%s754_s1 + $0xa0] sm:$0xff]   ;;  %v591_v23 = vld [vmem:[%s754_s1 + $0xa8] sm:$0xff]  }
   0x9   :  { %530 = vmatpush3.bf16.msra.mxu1 %v575_v7  ;;  %v592_v24 = vld [vmem:[%s754_s1 + $0x70] sm:$0xff]   ;;  %v596_v28 = vld [vmem:[%s754_s1 + $0x78] sm:$0xff]   ;;  %v15_v31 = vld [vmem:[%s755_s0] sm:$0xff] }
   0xa   :  { %531 = vmatprep.subr.bf16.mxu1 %v578_v10  ;;  %v593_v25 = vld [vmem:[%s754_s1 + $0x30] sm:$0xff]   ;;  %v597_v29 = vld [vmem:[%s754_s1 + $0x38] sm:$0xff]   ;;  %v463_v32 = vcombine.low %v15_v31, %v15_v31  ;;  %v464_v33 = vcombine.high %v15_v31, %v15_v31  ;;  %v16_v36 = vld [vmem:[%s755_s0 + $0x8] sm:$0xff] }
   0xb   :  { %510 = vmatpush3.bf16.msra.mxu0 %v577_v9  ;;  %v594_v26 = vld [vmem:[%s754_s1 + $0xf0] sm:$0xff]   ;;  %v598_v30 = vld [vmem:[%s754_s1 + $0xf8] sm:$0xff]   ;;  %v465_v37 = vcombine.low %v16_v36, %v16_v36  ;;  %v466_v38 = vcombine.high %v16_v36, %v16_v36  ;;  %v605_v39 = vld [vmem:[%s754_s1 + $0x100] sm:$0xff]  }
   0xc   :  { %511 = vmatprep.subr.bf16.mxu0 %v580_v12  ;;  %v595_v27 = vld [vmem:[%s754_s1 + $0xb0] sm:$0xff]   ;;  %v602_v34 = vld [vmem:[%s754_s1 + $0xb8] sm:$0xff]   ;;  %366 = vmatprep.mubr.bf16.mxu0 %v464_v33  ;;  %v606_v40 = vld [vmem:[%s754_s1 + $0x108] sm:$0xff]  }
   0xd   :  { %532 = vmatpush3.bf16.msra.mxu1 %v579_v11  ;;  %406 = vmatprep.mubr.bf16.mxu1 %v466_v38  ;;  %v607_v41 = vld [vmem:[%s754_s1 + $0x110] sm:$0xff]   ;;  %v608_v42 = vld [vmem:[%s754_s1 + $0x118] sm:$0xff]   ;;  %v462_v45 = vld [vmem:[%s756_s2] ss:$0 sm:$0xff] }
   0xe   :  { %533 = vmatprep.subr.bf16.mxu1 %v582_v14  ;;  %v601_v43 = vld [vmem:[%s755_s0 + $0x10] ss:$0 sps:$4 sm:$0xff]  }
   0xf   :  { %512 = vmatpush3.bf16.msra.mxu0 %v581_v13 }
  0x10   :  { %513 = vmatprep.subr.bf16.mxu0 %v584_v16 }
  0x11   :  { %534 = vmatpush3.bf16.msra.mxu1 %v583_v15 }
  0x12   :  { %535 = vmatprep.subr.bf16.mxu1 %v586_v18 }
  0x13   :  { %514 = vmatpush3.bf16.msra.mxu0 %v585_v17 }
  0x14   :  { %515 = vmatprep.subr.bf16.mxu0 %v588_v20 }
  0x15   :  { %536 = vmatpush3.bf16.msra.mxu1 %v587_v19 }
  0x16   :  { %537 = vmatprep.subr.bf16.mxu1 %v590_v22 }
  0x17   :  { %516 = vmatpush3.bf16.msra.mxu0 %v589_v21 }
  0x18   :  { %517 = vmatprep.subr.bf16.mxu0 %v592_v24 }
  0x19   :  { %538 = vmatpush3.bf16.msra.mxu1 %v591_v23 }
  0x1a   :  { %539 = vmatprep.subr.bf16.mxu1 %v594_v26 }
  0x1b   :  { %518 = vmatpush3.bf16.msra.mxu0 %v593_v25 }
  0x1c   :  { %519 = vmatprep.subr.bf16.mxu0 %v596_v28 }
  0x1d   :  { %540 = vmatpush3.bf16.msra.mxu1 %v595_v27 }
  0x1e   :  { %541 = vmatprep.subr.bf16.mxu1 %v598_v30 }
  0x1f   :  { %520 = vmatpush3.bf16.msra.mxu0 %v597_v29 }
  0x20   :  { %554 = vmatprep.subr.bf16.mxu0 %v609_v35 }
  0x21   :  { %542 = vmatpush3.bf16.msra.mxu1 %v602_v34 }
  0x22   :  { %367 = vmatmul.mubr.bf16.vlgmr.msra.gmra.mrb[0].mxu0 %v463_v32 }
  0x23   :  { %555 = vmatpush3.bf16.msra.mxu0 %v605_v39  ;;  %562 = vmatprep.mubr.msk.bf16.mxu0 %vm610_vm0, %v609_v35 }
  0x24   :  { %407 = vmatmul.mubr.bf16.vlgmr.msra.gmra.mrb[0].mxu1 %v465_v37  ;;  %556 = vmatprep.subr.bf16.mxu0 %v609_v35 }
  0x27   :  { %557 = vmatpush3.bf16.msra.mxu0 %v606_v40 }
  0x28   :  { %558 = vmatprep.subr.bf16.mxu0 %v609_v35 }
  0x2b   :  { %559 = vmatpush3.bf16.msra.mxu0 %v607_v41 }
  0x2c   :  { %560 = vmatprep.subr.bf16.mxu0 %v609_v35 }
  0x2f   :  { %561 = vmatpush3.bf16.msra.mxu0 %v608_v42 }
  0x32   :  { %563 = vmatmul.mubr.msk.bf16.vlgmr.msra.gmra.mrb[4].mxu0 %vm330_vm1, %v601_v43 }
  0xf5   :  { %v521_v44 = vpop.f32.mrb[0].mxu0 }
  0xf6   :  { %v522_v46 = vpop.f32.mrb[1].mxu0 }
  0xf7   :  { %v523_v47 = vadd.f32 %v522_v46, %v521_v44  ;;  %v524_v48 = vpop.f32.mrb[2].mxu0  ;;  %v543_v49 = vpop.f32.mrb[0].mxu1 }
  0xf8   :  { %v525_v50 = vpop.f32.mrb[3].mxu0  ;;  %v544_v51 = vpop.f32.mrb[1].mxu1 }
  0xf9   :  { %v369_v52 = vadd.f32 %v523_v47, %v462_v45  ;;  %v545_v53 = vadd.f32 %v544_v51, %v543_v49  ;;  %v546_v54 = vpop.f32.mrb[2].mxu1 }
  0xfa   :  { %v547_v55 = vpop.f32.mrb[3].mxu1 }
  0xfb   :  { %v409_v56 = vadd.f32 %v545_v53, %v369_v52 }
 0x105   :  { %v448_v57 = vpop.f32.mrb[4].mxu0 }
 0x106   :  { %v449_v58 = vadd.f32 %v448_v57, %v409_v56  ;;  %v564_v59 = vpop.f32.mrb[5].mxu0 }
 0x107   :  { %v451_v60 = vpop.f32.mrb[6].mxu0 }
 0x108   :  { %v454_v61 = vmax.f32 %v449_v58, 0.0  ;;  %v565_v62 = vpop.f32.mrb[7].mxu0 }
 0x10a   :  { %v455_v63 = vpack.c.bf16 %v454_v61, %v454_v61 }
 0x10c   :  { %457 = vst.msk [vmem:[%s757_s3] sm:$0xf] %vm456_vm2, %v455_v63 }

// kernel: racing_net_forward.9
= control target key start
LH: loop header
LB: loop body
LE: loop exit
PB: predicated region body
PF: predicated region fallthrough
CT: control target
= control target key end

     0   :  { %v390_v58 = vlaneseq  ;;  %vm394_vm2 = vcmask 56320   ;;  %s649_s1 = inlined_call_operand.vmem [shape: bf16[512,7], index: 1, kind: input, shape index: {}]   ;;  %s650_s0 = inlined_call_operand.vmem [shape: bf16[8,512], index: 0, kind: input, shape index: {}]   ;;  %s651_s2 = inlined_call_operand.vmem [shape: f32[1,7], index: 2, kind: input, shape index: {}]   ;;  %s652_s3 = inlined_call_operand.vmem [shape: f32[8,7], index: 3, kind: output, shape index: {}]  }
   0x1   :  { %v481_v0 = vld [vmem:[%s649_s1 + $0x40] sm:$0xff]   ;;  %v485_v4 = vld [vmem:[%s649_s1 + $0x48] sm:$0xff]   ;;  %v489_v8 = vld [vmem:[%s649_s1 + $0x50] sm:$0xff]  }
   0x2   :  { %v482_v1 = vld [vmem:[%s649_s1 + $0xc0] sm:$0xff]   ;;  %437 = vmatprep.subr.bf16.mxu0 %v481_v0  ;;  %v486_v5 = vld [vmem:[%s649_s1 + $0xc8] sm:$0xff]   ;;  %v490_v9 = vld [vmem:[%s649_s1 + $0xd0] sm:$0xff]   ;;  %v391_v63 = vand.u32 127, %v390_v58 }
   0x3   :  { %v483_v2 = vld [vmem:[%s649_s1] sm:$0xff]   ;;  %459 = vmatprep.subr.bf16.mxu1 %v482_v1  ;;  %v487_v6 = vld [vmem:[%s649_s1 + $0x8] sm:$0xff]   ;;  %v491_v10 = vld [vmem:[%s649_s1 + $0x10] sm:$0xff]  }
   0x4   :  { %v484_v3 = vld [vmem:[%s649_s1 + $0x80] sm:$0xff]   ;;  %438 = vmatpush3.bf16.msra.mxu0 %v483_v2  ;;  %v488_v7 = vld [vmem:[%s649_s1 + $0x88] sm:$0xff]   ;;  %v492_v11 = vld [vmem:[%s649_s1 + $0x90] sm:$0xff]   ;;  %vm392_vm1 = vcmp.lt.s32.totalorder %v391_v63, 6 }
   0x5   :  { %460 = vmatpush3.bf16.msra.mxu1 %v484_v3  ;;  %439 = vmatprep.subr.bf16.mxu0 %v485_v4  ;;  %v493_v12 = vld [vmem:[%s649_s1 + $0x58] sm:$0xff]   ;;  %v497_v16 = vld [vmem:[%s649_s1 + $0x60] sm:$0xff]   ;;  %v501_v20 = vld [vmem:[%s649_s1 + $0x68] sm:$0xff]  }
   0x6   :  { %461 = vmatprep.subr.bf16.mxu1 %v486_v5  ;;  %v494_v13 = vld [vmem:[%s649_s1 + $0xd8] sm:$0xff]   ;;  %v498_v17 = vld [vmem:[%s649_s1 + $0xe0] sm:$0xff]   ;;  %v502_v21 = vld [vmem:[%s649_s1 + $0xe8] sm:$0xff]  }
   0x7   :  { %v495_v14 = vld [vmem:[%s649_s1 + $0x18] sm:$0xff]   ;;  %v499_v18 = vld [vmem:[%s649_s1 + $0x20] sm:$0xff]   ;;  %v503_v22 = vld [vmem:[%s649_s1 + $0x28] sm:$0xff]  }
   0x8   :  { %440 = vmatpush3.bf16.msra.mxu0 %v487_v6  ;;  %v496_v15 = vld [vmem:[%s649_s1 + $0x98] sm:$0xff]   ;;  %v500_v19 = vld [vmem:[%s649_s1 + $0xa0] sm:$0xff]   ;;  %v504_v23 = vld [vmem:[%s649_s1 + $0xa8] sm:$0xff]  }
   0x9   :  { %462 = vmatpush3.bf16.msra.mxu1 %v488_v7  ;;  %441 = vmatprep.subr.bf16.mxu0 %v489_v8  ;;  %v505_v24 = vld [vmem:[%s649_s1 + $0x70] sm:$0xff]   ;;  %v509_v28 = vld [vmem:[%s649_s1 + $0x78] sm:$0xff]   ;;  %v15_v32 = vld [vmem:[%s650_s0] sm:$0xff] }
   0xa   :  { %463 = vmatprep.subr.bf16.mxu1 %v490_v9  ;;  %v506_v25 = vld [vmem:[%s649_s1 + $0xf0] sm:$0xff]   ;;  %v510_v29 = vld [vmem:[%s649_s1 + $0xf8] sm:$0xff]   ;;  %v16_v33 = vld [vmem:[%s650_s0 + $0x8] sm:$0xff]  ;;  %v401_v34 = vcombine.low %v15_v32, %v15_v32  ;;  %v402_v35 = vcombine.high %v15_v32, %v15_v32 }
   0xb   :  { %v507_v26 = vld [vmem:[%s649_s1 + $0x30] sm:$0xff]   ;;  %v511_v30 = vld [vmem:[%s649_s1 + $0x38] sm:$0xff]   ;;  %v403_v36 = vcombine.low %v16_v33, %v16_v33  ;;  %v404_v37 = vcombine.high %v16_v33, %v16_v33  ;;  %v400_v40 = vld [vmem:[%s651_s2] ss:$0 sm:$0xff] }
   0xc   :  { %442 = vmatpush3.bf16.msra.mxu0 %v491_v10  ;;  %v508_v27 = vld [vmem:[%s649_s1 + $0xb0] sm:$0xff]   ;;  %v512_v31 = vld [vmem:[%s649_s1 + $0xb8] sm:$0xff]   ;;  %326 = vmatprep.mubr.bf16.mxu0 %v402_v35 }
   0xd   :  { %464 = vmatpush3.bf16.msra.mxu1 %v492_v11  ;;  %443 = vmatprep.subr.bf16.mxu0 %v493_v12 }
   0xe   :  { %465 = vmatprep.subr.bf16.mxu1 %v494_v13  ;;  %366 = vmatprep.mubr.bf16.mxu1 %v404_v37 }
  0x10   :  { %444 = vmatpush3.bf16.msra.mxu0 %v495_v14 }
  0x11   :  { %466 = vmatpush3.bf16.msra.mxu1 %v496_v15  ;;  %445 = vmatprep.subr.bf16.mxu0 %v497_v16 }
  0x12   :  { %467 = vmatprep.subr.bf16.mxu1 %v498_v17 }
  0x14   :  { %446 = vmatpush3.bf16.msra.mxu0 %v499_v18 }
  0x15   :  { %468 = vmatpush3.bf16.msra.mxu1 %v500_v19  ;;  %447 = vmatprep.subr.bf16.mxu0 %v501_v20 }
  0x16   :  { %469 = vmatprep.subr.bf16.mxu1 %v502_v21 }
  0x18   :  { %448 = vmatpush3.bf16.msra.mxu0 %v503_v22 }
  0x19   :  { %470 = vmatpush3.bf16.msra.mxu1 %v504_v23  ;;  %449 = vmatprep.subr.bf16.mxu0 %v505_v24 }
  0x1a   :  { %471 = vmatprep.subr.bf16.mxu1 %v506_v25 }
  0x1c   :  { %450 = vmatpush3.bf16.msra.mxu0 %v507_v26 }
  0x1d   :  { %472 = vmatpush3.bf16.msra.mxu1 %v508_v27  ;;  %451 = vmatprep.subr.bf16.mxu0 %v509_v28 }
  0x1e   :  { %473 = vmatprep.subr.bf16.mxu1 %v510_v29 }
  0x20   :  { %452 = vmatpush3.bf16.msra.mxu0 %v511_v30 }
  0x21   :  { %474 = vmatpush3.bf16.msra.mxu1 %v512_v31 }
  0x23   :  { %327 = vmatmul.mubr.bf16.vlgmr.msra.gmra.mrb[0].mxu0 %v401_v34 }
  0x24   :  { %367 = vmatmul.mubr.bf16.vlgmr.msra.gmra.mrb[0].mxu1 %v403_v36 }
  0xf6   :  { %v453_v38 = vpop.f32.mrb[0].mxu0 }
  0xf7   :  { %v475_v39 = vpop.f32.mrb[0].mxu1  ;;  %v454_v41 = vpop.f32.mrb[1].mxu0 }
  0xf8   :  { %v476_v42 = vpop.f32.mrb[1].mxu1  ;;  %v455_v43 = vadd.f32 %v454_v41, %v453_v38  ;;  %v456_v45 = vpop.f32.mrb[2].mxu0 }
  0xf9   :  { %v477_v44 = vadd.f32 %v476_v42, %v475_v39  ;;  %v478_v46 = vpop.f32.mrb[2].mxu1  ;;  %v457_v47 = vpop.f32.mrb[3].mxu0 }
  0xfa   :  { %v479_v48 = vpop.f32.mrb[3].mxu1  ;;  %v329_v49 = vadd.f32 %v455_v43, %v400_v40 }
  0xfc   :  { %v369_v50 = vadd.f32 %v477_v44, %v329_v49 }
  0xfe   :  { %v375_v51 = vand.u32 2147483647, %v369_v50  ;;  %v374_v0 = vmax.f32 %v369_v50, 0.0 }
 0x100   :  { %v376_v52 = vsub.f32 0.0, %v375_v51 }
 0x102   :  { %v377_v53 = vmul.f32 1.442695, %v376_v52 }
 0x104   :  { %517 = vpow2.f32 %v377_v53 }
 0x10e   :  { %v518_v54 = vpop.eup %517 }
 0x10f   :  { %v379_v55 = vadd.f32 1.0, %v518_v54  ;;  %v382_v56 = vmul.f32 -0.5, %v518_v54  ;;  %v385_v59 = vand.u32 2147483647, %v518_v54 }
 0x111   :  { %519 = vlog2.f32 %v379_v55  ;;  %v383_v57 = vadd.f32 1.0, %v382_v56  ;;  %vm386_vm0 = vcmp.lt.f32.partialorder %v385_v59, 0.0004427343 }
 0x113   :  { %v384_v62 = vmul.f32 %v518_v54, %v383_v57 }
 0x11b   :  { %v520_v60 = vpop.eup %519 }
 0x11c   :  { %v381_v61 = vmul.f32 0.6931472, %v520_v60 }
 0x11e   :  { %v387_v1 = vsel %vm386_vm0, %v384_v62, %v381_v61 }
 0x11f   :  { %v388_v2 = vadd.f32 %v387_v1, %v374_v0 }
 0x121   :  { %v389_v3 = vadd.f32 1.0, %v388_v2 }
 0x123   :  { %v393_v4 = vsel %vm392_vm1, %v389_v3, %v369_v50 }
 0x124   :  { %395 = vst.msk [vmem:[%s652_s3] sm:$0xff] %vm394_vm2, %v393_v4 }

</bundles_post_ra>
